<compile_context>
chip_gen: v7x
topology: tpu7x:2x2x1
jax: 0.10.0
libtpu: 0.0.40
codegen_flags: <defaults>
</compile_context>

<pallas_src>
import functools
import math

import jax
import jax.numpy as jnp
from jax.experimental import pallas as pl
from jax.experimental.pallas import tpu as pltpu


def _round_up(x, m):
    return (x + m - 1) // m * m


# ----------------------------- Pallas kernel -----------------------------

def _make_subpixel_conv_kernel(th, wa, cin, cout):
    """Fused 2x2 im2col (from a (th+1)-row VMEM tile) + one MXU matmul."""
    k4 = 4 * cin
    n4 = 4 * cout

    def kernel(xm_ref, xh_ref, w_ref, b_ref, o_ref):
        # xm_ref: (1, th, Wp, Cin)  bf16  main rows of padded activation
        # xh_ref: (1, 1,  Wp, Cin)  bf16  1-row halo (row `th` of this tile)
        # w_ref : (4*Cin, 4*Cout)   bf16  folded subpixel weights (resident)
        # b_ref : (1, 4*Cout)       f32   bias tiled over the 4 output parities
        # o_ref : (1, th*Wa, 4*Cout) f32
        rows = jnp.concatenate([xm_ref[0], xh_ref[0]], axis=0)       # (th+1, Wp, Cin)
        # 2x2 tap extraction in VMEM; K ordering (dr, dc, ci) matches w_ref rows.
        taps = [rows[dr:dr + th, dc:dc + wa, :].reshape(th * wa, cin)
                for dr in (0, 1) for dc in (0, 1)]
        a = jnp.concatenate(taps, axis=-1)                           # (th*Wa, 4*Cin)
        acc = jnp.dot(a, w_ref[...], preferred_element_type=jnp.float32)
        o_ref[0] = (acc + b_ref[...]).astype(o_ref.dtype)

    return kernel


def _pick_row_tile(h, wa, cout):
    """Anchor-row tile: multiple of 8, capped so the f32 output tile stays ~<=4 MiB
    so the double-buffered pipeline fits the scoped-VMEM default on v5e/v6e/v7x."""
    ha_need = h + 1
    row_bytes = wa * 4 * cout * 4
    cap = max(8, ((4 * 1024 * 1024) // row_bytes) // 8 * 8)
    return max(8, min(_round_up(ha_need, 8), 64, cap))


def upsample_conv3x3_pallas(x_nchw, w_fold, bias4):
    """nearest-2x upsample + 3x3 conv (stride 1, pad 1), fused subpixel form.

    x_nchw: (N, Cin, H, W)   f32
    w_fold: (4*Cin, 4*Cout)  f32, row index (dr*2+dc)*Cin+ci, col (p*2+q)*Cout+co,
            so output pixel (2A-1+p, 2B-1+q) = sum Wf * xpad[A+dr, B+dc, ci] + b
    bias4 : (1, 4*Cout)      f32, bias tiled over the 4 parities
    returns (N, Cout, 2H, 2W) f32
    """
    N, Cin, H, W = x_nchw.shape
    K4, N4 = w_fold.shape
    assert K4 == 4 * Cin
    Cout = N4 // 4

    # Anchor grid: A in [0, H], B in [0, W]; padded up for tiling / (8,128) layout.
    wa = _round_up(W + 1, 8)
    th = _pick_row_tile(H, wa, Cout)
    ha = _round_up(H + 1, th)
    Hp, Wp = ha + 1, wa + 1

    # Cast to bf16 BEFORE layout plumbing so the transpose / pad move half the bytes.
    xhwc = jnp.transpose(x_nchw.astype(jnp.bfloat16), (0, 2, 3, 1))      # (N,H,W,Cin)
    xp = jnp.pad(xhwc, ((0, 0), (1, Hp - H - 1), (1, Wp - W - 1), (0, 0)))

    grid = (N, ha // th)
    kernel = _make_subpixel_conv_kernel(th, wa, Cin, Cout)

    flops = 2 * N * ha * wa * K4 * N4
    bytes_accessed = xp.size * 2 + K4 * N4 * 2 + N4 * 4 + N * ha * wa * N4 * 4

    out_flat = pl.pallas_call(
        kernel,
        out_shape=jax.ShapeDtypeStruct((N, ha * wa, N4), jnp.float32),
        grid=grid,
        in_specs=[
            pl.BlockSpec((1, th, Wp, Cin), lambda n, i: (n, i, 0, 0)),          # main rows
            pl.BlockSpec((1, 1, Wp, Cin), lambda n, i: (n, i * th + th, 0, 0)),  # halo row
            pl.BlockSpec((K4, N4), lambda n, i: (0, 0)),                        # weights
            pl.BlockSpec((1, N4), lambda n, i: (0, 0)),                         # bias
        ],
        out_specs=pl.BlockSpec((1, th * wa, N4), lambda n, i: (n, i, 0)),
        compiler_params=pltpu.CompilerParams(
            dimension_semantics=("parallel", "parallel")),
        cost_estimate=pl.CostEstimate(
            flops=int(flops), transcendentals=0, bytes_accessed=int(bytes_accessed)),
    )(xp, xp, w_fold.astype(jnp.bfloat16), bias4.astype(jnp.float32))

    # (N, ha*wa, 4*Cout) -> (N, 2H, 2W, Cout):  output (Y, X) = (2A-1+p, 2B-1+q)
    out = out_flat.reshape(N, ha, wa, 2, 2, Cout)[:, :H + 1, :W + 1]
    out = out.transpose(0, 1, 3, 2, 4, 5).reshape(N, 2 * H + 2, 2 * W + 2, Cout)
    out = out[:, 1:2 * H + 1, 1:2 * W + 1, :]
    return jnp.transpose(out, (0, 3, 1, 2))                                   # NCHW


# ----------------------------- Upsample forward -----------------------------

def upsample_forward(params, x_nchw, *, use_conv=True, dims=2):
    """Matches Upsample.forward for dims=2: nearest-2x upsample (+ optional 3x3 conv)."""
    if dims != 2:
        # TODO(synk): dims=1 / dims=3 variants (1D upsample, inner-two-dim 3D upsample
        # feeding a 3D conv) are not exercised by this configuration.
        raise NotImplementedError("only dims=2 is implemented")
    if not use_conv:
        N, C, H, W = x_nchw.shape
        x = jnp.broadcast_to(x_nchw[:, :, :, None, :, None], (N, C, H, 2, W, 2))
        return x.reshape(N, C, 2 * H, 2 * W)
    assert 4 * x_nchw.shape[1] == params['w_fold'].shape[0]
    return upsample_conv3x3_pallas(x_nchw, params['w_fold'], params['b4'])


def _fold_upsample_conv_weight(w_torch):
    """Fold 3x3 conv taps over a nearest-2x upsample into per-parity 2x2 taps (f32)."""
    Cout, Cin, _, _ = w_torch.shape
    w_hw = jnp.transpose(w_torch, (2, 3, 1, 0)).astype(jnp.float32)   # (3,3,Cin,Cout)
    wf = jnp.zeros((2, 2, Cin, 2, 2, Cout), jnp.float32)
    for p in range(2):
        for q in range(2):
            for kh in range(3):
                dr = (p + kh) // 2
                for kw in range(3):
                    dc = (q + kw) // 2
                    wf = wf.at[dr, dc, :, p, q, :].add(w_hw[kh, kw])
    return wf.reshape(4 * Cin, 4 * Cout)


def init_upsample_params(channels, out_channels=None, seed=0):
    """PyTorch default Conv2d init (uniform +-1/sqrt(fan_in)); per-parity fold in f32."""
    out_channels = out_channels or channels
    k1, k2 = jax.random.split(jax.random.PRNGKey(seed))
    fan_in = channels * 9
    bound = 1.0 / math.sqrt(fan_in)
    w = jax.random.uniform(k1, (out_channels, channels, 3, 3), jnp.float32, -bound, bound)
    b = jax.random.uniform(k2, (out_channels,), jnp.float32, -bound, bound)
    return {
        'w_torch': w,
        'b': b,
        'w_fold': _fold_upsample_conv_weight(w),
        'b4': jnp.tile(b, 4).reshape(1, 4 * out_channels),
    }


# ----------------------------- reference & main -----------------------------

def _reference_forward(params, x_nchw):
    """Pure-XLA f32 reference: nearest-2x upsample, then 3x3 SAME conv + bias."""
    x = jnp.transpose(x_nchw, (0, 2, 3, 1)).astype(jnp.float32)
    x = jnp.repeat(jnp.repeat(x, 2, axis=1), 2, axis=2)
    w_hwio = jnp.transpose(params['w_torch'], (2, 3, 1, 0))            # (3,3,Cin,Cout)
    y = jax.lax.conv_general_dilated(
        x, w_hwio, window_strides=(1, 1), padding='SAME',
        dimension_numbers=('NHWC', 'HWIO', 'NHWC'))
    y = y + params['b']
    return jnp.transpose(y, (0, 3, 1, 2))


if __name__ == "__main__":
    # Upsample(channels=64, use_conv=True, dims=2); small deterministic shapes.
    N, C, H, W = 2, 64, 16, 16
    key = jax.random.PRNGKey(0)
    x = jax.random.normal(key, (N, C, H, W), jnp.float32)

    params = init_upsample_params(C, seed=0)

    fwd = jax.jit(functools.partial(upsample_forward, params))
    out = jax.block_until_ready(fwd(x))

    assert out.shape == (N, C, 2 * H, 2 * W), out.shape
    assert bool(jnp.all(jnp.isfinite(out)))

    ref = jax.block_until_ready(
        jax.jit(functools.partial(_reference_forward, params))(x))
    err = float(jnp.max(jnp.abs(out - ref)))
    assert err < 5e-2, f"max |pallas - ref| = {err}"

    print("KERNEL_OK")
</pallas_src>

<mosaic_0001>
module attributes {stable_mosaic.version = 11 : i64} {
  func.func @kernel(%arg0: i32, %arg1: i32, %arg2: memref<1x24x25x64xbf16, #tpu.memory_space<vmem>>, %arg3: memref<1x1x25x64xbf16, #tpu.memory_space<vmem>>, %arg4: memref<256x256xbf16, #tpu.memory_space<vmem>>, %arg5: memref<1x256xf32, #tpu.memory_space<vmem>>, %arg6: memref<1x576x256xf32, #tpu.memory_space<vmem>>) attributes {dimension_semantics = [#tpu.dimension_semantics<parallel>, #tpu.dimension_semantics<parallel>], iteration_bounds = array<i64: 2, 1>, scalar_prefetch = 0 : i64, scratch_operands = 0 : i64, tpu.core_type = #tpu.core_type<tc>, window_params = [{transform_indices = @transform_0, window_bounds = array<i64: 1, 24, 25, 64>}, {transform_indices = @transform_1, window_bounds = array<i64: 1, 1, 25, 64>}, {pipeline_mode = #tpu.pipeline_mode<synchronous>, transform_indices = @transform_2, window_bounds = array<i64: 256, 256>}, {pipeline_mode = #tpu.pipeline_mode<synchronous>, transform_indices = @transform_3, window_bounds = array<i64: 1, 256>}, {transform_indices = @transform_4, window_bounds = array<i64: 1, 576, 256>}]} {
    %c0 = arith.constant 0 : index
    %c0_0 = arith.constant 0 : index
    %c0_1 = arith.constant 0 : index
    %c0_2 = arith.constant 0 : index
    %0 = vector.load %arg2[%c0, %c0_0, %c0_1, %c0_2] : memref<1x24x25x64xbf16, #tpu.memory_space<vmem>>, vector<1x24x25x64xbf16>
    %1 = vector.shape_cast %0 : vector<1x24x25x64xbf16> to vector<24x25x64xbf16>
    %c0_3 = arith.constant 0 : index
    %c0_4 = arith.constant 0 : index
    %c0_5 = arith.constant 0 : index
    %c0_6 = arith.constant 0 : index
    %2 = vector.load %arg3[%c0_3, %c0_4, %c0_5, %c0_6] : memref<1x1x25x64xbf16, #tpu.memory_space<vmem>>, vector<1x1x25x64xbf16>
    %3 = vector.shape_cast %2 : vector<1x1x25x64xbf16> to vector<1x25x64xbf16>
    %4 = tpu.concatenate %1, %3 in 0 : vector<24x25x64xbf16>, vector<1x25x64xbf16> -> vector<25x25x64xbf16>
    %5 = vector.extract_strided_slice %4 {offsets = [0, 0, 0], sizes = [24, 24, 64], strides = [1, 1, 1]} : vector<25x25x64xbf16> to vector<24x24x64xbf16>
    %6 = vector.shape_cast %5 : vector<24x24x64xbf16> to vector<576x64xbf16>
    %7 = vector.extract_strided_slice %4 {offsets = [0, 1, 0], sizes = [24, 24, 64], strides = [1, 1, 1]} : vector<25x25x64xbf16> to vector<24x24x64xbf16>
    %8 = vector.shape_cast %7 : vector<24x24x64xbf16> to vector<576x64xbf16>
    %9 = vector.extract_strided_slice %4 {offsets = [1, 0, 0], sizes = [24, 24, 64], strides = [1, 1, 1]} : vector<25x25x64xbf16> to vector<24x24x64xbf16>
    %10 = vector.shape_cast %9 : vector<24x24x64xbf16> to vector<576x64xbf16>
    %11 = vector.extract_strided_slice %4 {offsets = [1, 1, 0], sizes = [24, 24, 64], strides = [1, 1, 1]} : vector<25x25x64xbf16> to vector<24x24x64xbf16>
    %12 = vector.shape_cast %11 : vector<24x24x64xbf16> to vector<576x64xbf16>
    %13 = tpu.concatenate %6, %8, %10, %12 in 1 : vector<576x64xbf16>, vector<576x64xbf16>, vector<576x64xbf16>, vector<576x64xbf16> -> vector<576x256xbf16>
    %c0_7 = arith.constant 0 : index
    %c0_8 = arith.constant 0 : index
    %14 = vector.load %arg4[%c0_7, %c0_8] : memref<256x256xbf16, #tpu.memory_space<vmem>>, vector<256x256xbf16>
    %cst = arith.constant dense<0.000000e+00> : vector<576x256xf32>
    %15 = tpu.matmul %13, %14, %cst {dimension_numbers = #tpu.dot_dimension_numbers<[1], [0], [0], [1], [0, 0, 1, 1], [], []>} : vector<576x256xbf16>, vector<256x256xbf16>, vector<576x256xf32> -> vector<576x256xf32>
    %c0_9 = arith.constant 0 : index
    %c0_10 = arith.constant 0 : index
    %16 = vector.load %arg5[%c0_9, %c0_10] : memref<1x256xf32, #tpu.memory_space<vmem>>, vector<1x256xf32>
    %17 = vector.broadcast %16 : vector<1x256xf32> to vector<576x256xf32>
    %18 = arith.addf %15, %17 : vector<576x256xf32>
    %c0_11 = arith.constant 0 : index
    %c0_12 = arith.constant 0 : index
    %c0_13 = arith.constant 0 : index
    %19 = vector.load %arg6[%c0_11, %c0_12, %c0_13] : memref<1x576x256xf32, #tpu.memory_space<vmem>>, vector<1x576x256xf32>
    %20 = vector.shape_cast %19 : vector<1x576x256xf32> to vector<576x256xf32>
    %21 = vector.shape_cast %18 : vector<576x256xf32> to vector<1x576x256xf32>
    tpu.vector_store %arg6[%c0_11, %c0_12, %c0_13], %21 {strides = array<i32>} : memref<1x576x256xf32, #tpu.memory_space<vmem>>, vector<1x576x256xf32>,
    return
  }
  func.func @transform_0(%arg0: i32, %arg1: i32) -> (i32, i32, i32, i32) {
    %c0_i32 = arith.constant 0 : i32
    %c0_i32_0 = arith.constant 0 : i32
    %c0_i32_1 = arith.constant 0 : i32
    return %arg0, %arg1, %c0_i32, %c0_i32_0 : i32, i32, i32, i32
  }
  func.func @transform_1(%arg0: i32, %arg1: i32) -> (i32, i32, i32, i32) {
    %c24_i32 = arith.constant 24 : i32
    %0 = arith.muli %arg1, %c24_i32 : i32
    %c24_i32_0 = arith.constant 24 : i32
    %1 = arith.addi %0, %c24_i32_0 : i32
    %c0_i32 = arith.constant 0 : i32
    %c0_i32_1 = arith.constant 0 : i32
    %c0_i32_2 = arith.constant 0 : i32
    return %arg0, %1, %c0_i32, %c0_i32_1 : i32, i32, i32, i32
  }
  func.func @transform_2(%arg0: i32, %arg1: i32) -> (i32, i32) {
    %c0_i32 = arith.constant 0 : i32
    %c0_i32_0 = arith.constant 0 : i32
    %c0_i32_1 = arith.constant 0 : i32
    return %c0_i32, %c0_i32_0 : i32, i32
  }
  func.func @transform_3(%arg0: i32, %arg1: i32) -> (i32, i32) {
    %c0_i32 = arith.constant 0 : i32
    %c0_i32_0 = arith.constant 0 : i32
    %c0_i32_1 = arith.constant 0 : i32
    return %c0_i32, %c0_i32_0 : i32, i32
  }
  func.func @transform_4(%arg0: i32, %arg1: i32) -> (i32, i32, i32) {
    %c0_i32 = arith.constant 0 : i32
    %c0_i32_0 = arith.constant 0 : i32
    return %arg0, %arg1, %c0_i32 : i32, i32, i32
  }
}

</mosaic_0001>

<bundles_post_ra>
// kernel: upsample_forward.1
= control target key start
LH: loop header
LB: loop body
LE: loop exit
PB: predicated region body
PF: predicated region fallthrough
CT: control target
= control target key end

     0   :  { %s3400_s15 = smov 0   ;;  %s3402_s16 = smov 0   ;;  %s4939_s0 = inlined_call_operand.vmem [shape: bf16[2,25,25,64], index: 0, kind: input, shape index: {}, may-alias: {0,1}]   ;;  %s4940_s1 = inlined_call_operand.vmem [shape: bf16[2,25,25,64], index: 1, kind: input, shape index: {}, may-alias: {0,1}]   ;;  %s4941_s2 = inlined_call_operand.vmem [shape: bf16[256,256], index: 2, kind: input, shape index: {}]   ;;  %s4942_s3 = inlined_call_operand.vmem [shape: f32[1,256], index: 3, kind: input, shape index: {}]   ;;  %s4943_s4 = inlined_call_operand.vmem [shape: f32[2,576,256], index: 4, kind: output, shape index: {}]  }
   0x1   :  { %s3404_s17 = smov 0  }
   0x2 LB: > { %s26_s18 = sadd.s32 1, %s3368_s16  ;;  %p2932_p0 = scmp.ge.s32.totalorder %s3372_s17, 1  ;;  %s3372_s17 = sphi %s3404_s17, %s14_s17   ;;  %s3368_s16 = sphi %s3402_s16, %s4965_s16   ;;  %s3364_s15 = sphi %s3400_s15, %s4964_s15  }
   0x3   : > { %p28_p1 = scmp.ge.s32.totalorder %s26_s18, 2  ;;  %p218_p2 = scmp.lt.s32.totalorder %s3372_s17, 3 }
   0x5   : > { %s4967_s18 = smov (%p28_p1, %s26_s18), 0  ;;  %p219_p3 = pnand %p2932_p0, %p218_p2 }
   0x7   : > { %222 = sbr.rel (%p219_p3) target bundleno = 534 (0x216), region = 36 }
   0xe   : > { %p276_p4 = scmp.lt.s32.totalorder %s3364_s15, 1  ;;  %v3177_v0 = vld [vmem:[%s4941_s2 + $0x4] ss:$8 sps:$4 sm:$0xff]   ;;  %v3179_v1 = vld [vmem:[%s4941_s2] ss:$8 sps:$4 sm:$0xff]   ;;  %s3374_s13 = smov 64  }
   0xf   : > { %v3180_v2 = vld [vmem:[%s4941_s2 + $0x14] ss:$8 sps:$4 sm:$0xff]   ;;  %vm415_vm0 = vsmask.f32 3328  ;;  %2274 = vmatprep.subr.bf16.mxu0 %v3177_v0  ;;  %3116 = vmatprep.subr.bf16.mxu1 %v3177_v0  ;;  %v3182_v3 = vld [vmem:[%s4941_s2 + $0x10] ss:$8 sps:$4 sm:$0xff]  }
  0x10   : > { %s4969_s15 = smov (!%p276_p4, %s3364_s15), 1  ;;  %2275 = vmatpush1.bf16.msra.mxu0 %v3179_v1  ;;  %3132 = vmatpush1.bf16.msra.mxu1 %v3179_v1  ;;  %vm416_vm1 = vsmask.f32 7440  ;;  %v3183_v4 = vld [vmem:[%s4941_s2 + $0x24] ss:$8 sps:$4 sm:$0xff]   ;;  %vm1781_vm3 = vcmask 523264  }
  0x11   : > { %s3148_s25 = smul.u32 400, %s4969_s15  ;;  %2276 = vmatprep.subr.bf16.mxu0 %v3180_v2  ;;  %3117 = vmatprep.subr.bf16.mxu1 %v3180_v2  ;;  %v3185_v8 = vld [vmem:[%s4941_s2 + $0x20] ss:$8 sps:$4 sm:$0xff]   ;;  %v3186_v14 = vld [vmem:[%s4941_s2 + $0x34] ss:$8 sps:$4 sm:$0xff]   ;;  %vm3459_vm2 = vmor %vm415_vm0, %vm416_vm1 }
  0x12   : > { %v3188_v39 = vld [vmem:[%s4941_s2 + $0x30] ss:$8 sps:$4 sm:$0xff]   ;;  %s3150_s7 = smul.u32 1152, %s4969_s15 }
  0x13   : > { %s3438_s30 = scalar_lea.vmem %s4939_s0, %s3148_s25  ;;  %s3115_s29 = sadd.s32 384, %s3148_s25 }
  0x14   : > { %v319_v5 = vld [vmem:[%s3438_s30 + $0x10] sm:$0xf]  ;;  %v320_v6 = vld [vmem:[%s3438_s30 + $0x14] sm:$0xf]  ;;  %v321_v7 = vld [vmem:[%s3438_s30 + $0x18] sm:$0xf]  ;;  %2277 = vmatpush1.bf16.msra.mxu0 %v3182_v3  ;;  %3133 = vmatpush1.bf16.msra.mxu1 %v3182_v3  ;;  %s4274_s6 = scalar_lea.vmem %s4940_s1, %s3115_s29  ;;  %s4640_s10 = scalar_lea.vmem %s4943_s4, %s3150_s7 }
  0x15   : > { %v322_v9 = vld [vmem:[%s3438_s30 + $0x1c] sm:$0x1]  ;;  %v453_v10 = vshrl.u32 %v319_v5, 16  ;;  %v456_v11 = vshll.u32 %v319_v5, 16  ;;  %v462_v12 = vshll.u32 %v320_v6, 16  ;;  %v466_v13 = vshrl.u32 %v320_v6, 16  ;;  %2278 = vmatprep.subr.bf16.mxu0 %v3183_v4  ;;  %3118 = vmatprep.subr.bf16.mxu1 %v3183_v4 }
  0x16   : > { %v472_v15 = vshll.u32 %v321_v7, 16  ;;  %v476_v16 = vshrl.u32 %v321_v7, 16  ;;  %v482_v17 = vshll.u32 %v322_v9, 16  ;;  %v317_v18 = vld [vmem:[%s3438_s30 + $0x8] sm:$0xf] }
  0x17   : > { %v455_v19 = vrot.slane %v453_v10, 4  ;;  %v458_v20 = vrot.slane %v456_v11, 5  ;;  %v464_v21 = vrot.slane %v462_v12, 5  ;;  %v468_v22 = vrot.slane %v466_v13, 4  ;;  %v318_v23 = vld [vmem:[%s3438_s30 + $0xc] sm:$0x1] }
  0x18   : > { %v474_v24 = vrot.slane %v472_v15, 5  ;;  %v478_v25 = vrot.slane %v476_v16, 4  ;;  %v484_v26 = vrot.slane %v482_v17, 5  ;;  %v438_v27 = vshll.u32 %v317_v18, 16  ;;  %v315_v28 = vld [vmem:[%s3438_s30] sm:$0xf]  ;;  %2279 = vmatpush1.bf16.msra.mxu0 %v3185_v8  ;;  %3134 = vmatpush1.bf16.msra.mxu1 %v3185_v8 }
  0x19   : > { %v459_v29 = vor.u32 %v458_v20, %v455_v19  ;;  %v469_v30 = vor.u32 %v468_v22, %v464_v21  ;;  %v442_v31 = vshrl.u32 %v317_v18, 16  ;;  %v448_v32 = vshll.u32 %v318_v23, 16  ;;  %v316_v33 = vld [vmem:[%s3438_s30 + $0x4] sm:$0xf]  ;;  %2280 = vmatprep.subr.bf16.mxu0 %v3186_v14  ;;  %3119 = vmatprep.subr.bf16.mxu1 %v3186_v14  ;;  %v367_v48 = vld [vmem:[%s3438_s30 + $0xd0] sm:$0xf] }
  0x1a   : > { %v479_v35 = vor.u32 %v478_v25, %v474_v24  ;;  %v3463_v36 = vrot.slane %v438_v27, 5  ;;  %v419_v37 = vshrl.u32 %v315_v28, 16  ;;  %v422_v38 = vshll.u32 %v315_v28, 16  ;;  %v368_v53 = vld [vmem:[%s3438_s30 + $0xd4] sm:$0xf] }
  0x1b   : > { %v460_v40 = vrot.slane %v459_v29, 4  ;;  %v470_v41 = vrot.slane %v469_v30, 4  ;;  %v444_v42 = vrot.slane %v442_v31, 4  ;;  %v450_v43 = vrot.slane %v448_v32, 5  ;;  %v3483_v58 = vld [vmem:[%s3438_s30 + $0xd8] sm:$0xf] }
  0x1c   : > { %v480_v44 = vrot.slane %v479_v35, 4  ;;  %v421_v45 = vrot.slane %v419_v37, 4  ;;  %v424_v46 = vrot.slane %v422_v38, 5  ;;  %v428_v47 = vshll.u32 %v316_v33, 16  ;;  %2281 = vmatpush1.bf16.msra.mxu0 %v3188_v39  ;;  %3135 = vmatpush1.bf16.msra.mxu1 %v3188_v39  ;;  %v363_v3 = vld [vmem:[%s3438_s30 + $0xc0] sm:$0xf] }
  0x1d   : > { %v465_v49 = vsel %vm3459_vm2, %v460_v40, %v464_v21  ;;  %v3473_v50 = vsel %vm3459_vm2, %v470_v41, %v474_v24  ;;  %v445_v51 = vor.u32 %v444_v42, %v3463_v36  ;;  %v432_v52 = vshrl.u32 %v316_v33, 16  ;;  %v364_v8 = vld [vmem:[%s3438_s30 + $0xc4] sm:$0xf]  ;;  %v3498_v13 = vld [vmem:[%s3438_s30 + $0xc8] sm:$0xf] }
  0x1e   : > { %v3479_v54 = vsel %vm3459_vm2, %v480_v44, %v484_v26  ;;  %v3044_v55 = vcombine.low %v465_v49, %v3473_v50  ;;  %v425_v56 = vor.u32 %v424_v46, %v421_v45  ;;  %v430_v57 = vrot.slane %v428_v47, 5  ;;  %v323_v22 = vld [vmem:[%s3438_s30 + $0x20] sm:$0xf]  ;;  %v324_v27 = vld [vmem:[%s3438_s30 + $0x24] sm:$0xf] }
  0x1f   : > { %v2974_v59 = vcombine.low %v3473_v50, %v3479_v54  ;;  %v446_v60 = vrot.slane %v445_v51, 4  ;;  %v434_v61 = vrot.slane %v432_v52, 4  ;;  %v861_v62 = vshrl.u32 %v367_v48, 16  ;;  %v370_v41 = vld [vmem:[%s3438_s30 + $0xdc] sm:$0x1] }
  0x20   : > { %1709 = vrot.lane.b32.xlu0 %v3044_v55, %s3374_s13  ;;  %v426_v63 = vrot.slane %v425_v56, 4  ;;  %v864_v0 = vshll.u32 %v367_v48, 16  ;;  %v870_v1 = vshll.u32 %v368_v53, 16  ;;  %v874_v2 = vshrl.u32 %v368_v53, 16  ;;  %v371_v42 = vld [vmem:[%s3438_s30 + $0xe0] sm:$0xf] }
  0x21   : > { %v451_v4 = vsel %vm3459_vm2, %v446_v60, %v450_v43  ;;  %v435_v5 = vor.u32 %v434_v61, %v430_v57  ;;  %v863_v6 = vrot.slane %v861_v62, 4  ;;  %v880_v7 = vshll.u32 %v3483_v58, 16  ;;  %v372_v46 = vld [vmem:[%s3438_s30 + $0xe4] sm:$0xf] }
  0x22   : > { %v3493_v9 = vcombine.low %v451_v4, %v465_v49  ;;  %v431_v10 = vsel %vm3459_vm2, %v426_v63, %v430_v57  ;;  %v866_v11 = vrot.slane %v864_v0, 5  ;;  %v872_v12 = vrot.slane %v870_v1, 5  ;;  %v366_v63 = vld [vmem:[%s3438_s30 + $0xcc] sm:$0x1]  ;;  %v325_v4 = vld [vmem:[%s3438_s30 + $0x28] sm:$0xf] }
  0x23   : > { %v436_v14 = vrot.slane %v435_v5, 4  ;;  %v876_v15 = vrot.slane %v874_v2, 4  ;;  %v882_v16 = vrot.slane %v880_v7, 5  ;;  %v827_v17 = vshrl.u32 %v363_v3, 16 }
  0x24   : > { %v867_v18 = vor.u32 %v866_v11, %v863_v6  ;;  %v830_v19 = vshll.u32 %v363_v3, 16  ;;  %v836_v20 = vshll.u32 %v364_v8, 16  ;;  %v840_v21 = vshrl.u32 %v364_v8, 16 }
  0x25   : > { %v441_v23 = vsel %vm3459_vm2, %v436_v14, %v3463_v36  ;;  %v877_v24 = vor.u32 %v876_v15, %v872_v12  ;;  %v829_v25 = vrot.slane %v827_v17, 4  ;;  %v846_v26 = vshll.u32 %v3498_v13, 16  ;;  %v326_v17 = vld [vmem:[%s3438_s30 + $0x2c] sm:$0x1] }
  0x26   : > { %v2972_v28 = vcombine.low %v431_v10, %v441_v23  ;;  %v868_v29 = vrot.slane %v867_v18, 4  ;;  %v832_v30 = vrot.slane %v830_v19, 5  ;;  %v838_v31 = vrot.slane %v836_v20, 5  ;;  %v373_v20 = vld [vmem:[%s3438_s30 + $0xe8] sm:$0xf] }
  0x27   : > { %v878_v32 = vrot.slane %v877_v24, 4  ;;  %v842_v33 = vrot.slane %v840_v21, 4  ;;  %v3506_v35 = vrot.slane %v846_v26, 5  ;;  %v487_v37 = vshrl.u32 %v323_v22, 16 }
  0x28   : > { %1556 = vrot.lane.b32.xlu1 %v2972_v28, %s3374_s13  ;;  %v3511_v36 = vsel %vm3459_vm2, %v868_v29, %v872_v12  ;;  %v833_v38 = vor.u32 %v832_v30, %v829_v25  ;;  %v490_v39 = vshll.u32 %v323_v22, 16  ;;  %v496_v40 = vshll.u32 %v324_v27, 16 }
  0x29   : > { %v3517_v43 = vsel %vm3459_vm2, %v878_v32, %v882_v16  ;;  %v843_v44 = vor.u32 %v842_v33, %v838_v31  ;;  %v489_v45 = vrot.slane %v487_v37, 4  ;;  %v884_v47 = vshrl.u32 %v3483_v58, 16 }
  0x2a   : > { %v3062_v48 = vcombine.low %v3511_v36, %v3517_v43  ;;  %v834_v49 = vrot.slane %v833_v38, 4  ;;  %v492_v51 = vrot.slane %v490_v39, 5  ;;  %v498_v52 = vrot.slane %v496_v40, 5  ;;  %v374_v38 = vld [vmem:[%s3438_s30 + $0xec] sm:$0x1] }
  0x2b   : > { %v844_v53 = vrot.slane %v843_v44, 4  ;;  %v886_v55 = vrot.slane %v884_v47, 4  ;;  %v890_v56 = vshll.u32 %v370_v41, 16  ;;  %v895_v57 = vshrl.u32 %v371_v42, 16 }
  0x2c   : > { %1745 = vrot.lane.b32.xlu0 %v3062_v48, %s3374_s13  ;;  %v3526_v60 = vsel %vm3459_vm2, %v834_v49, %v838_v31  ;;  %v493_v61 = vor.u32 %v492_v51, %v489_v45  ;;  %v898_v62 = vshll.u32 %v371_v42, 16  ;;  %v904_v58 = vshll.u32 %v372_v46, 16  ;;  %v327_v48 = vld [vmem:[%s3438_s30 + $0x30] sm:$0xf] }
  0x2d   : > { %v3532_v0 = vsel %vm3459_vm2, %v844_v53, %v3506_v35  ;;  %v887_v1 = vor.u32 %v886_v55, %v882_v16  ;;  %v892_v2 = vrot.slane %v890_v56, 5  ;;  %v897_v3 = vrot.slane %v895_v57, 4  ;;  %v328_v55 = vld [vmem:[%s3438_s30 + $0x34] sm:$0xf] }
  0x2e   : > { %v2990_v5 = vcombine.low %v3526_v60, %v3532_v0  ;;  %v494_v6 = vrot.slane %v493_v61, 4  ;;  %v900_v7 = vrot.slane %v898_v62, 5  ;;  %v906_v8 = vrot.slane %v904_v58, 5  ;;  %v3582_v62 = vld [vmem:[%s3438_s30 + $0x38] sm:$0xf] }
  0x2f   : > { %v888_v10 = vrot.slane %v887_v1, 4  ;;  %v850_v11 = vshrl.u32 %v3498_v13, 16  ;;  %v856_v12 = vshll.u32 %v366_v63, 16  ;;  %v500_v14 = vshrl.u32 %v324_v27, 16  ;;  %v375_v58 = vld [vmem:[%s3438_s30 + $0xf0] sm:$0xf] }
  0x30   : > { %1592 = vrot.lane.b32.xlu1 %v2990_v5, %s3374_s13  ;;  %v3541_v15 = vsel %vm3459_vm2, %v494_v6, %v498_v52  ;;  %v901_v16 = vor.u32 %v900_v7, %v897_v3  ;;  %v506_v18 = vshll.u32 %v325_v4, 16  ;;  %v510_v19 = vshrl.u32 %v325_v4, 16  ;;  %v376_v4 = vld [vmem:[%s3438_s30 + $0xf4] sm:$0xf] }
  0x31   : > { %v3045_v21 = vcombine.low %v3479_v54, %v3541_v15  ;;  %v3549_v13 = vsel %vm3459_vm2, %v888_v10, %v892_v2  ;;  %v852_v22 = vrot.slane %v850_v11, 4  ;;  %v858_v23 = vrot.slane %v856_v12, 5 }
  0x32   : > { %v902_v24 = vrot.slane %v901_v16, 4  ;;  %v502_v25 = vrot.slane %v500_v14, 4  ;;  %v508_v26 = vrot.slane %v506_v18, 5  ;;  %v512_v27 = vrot.slane %v510_v19, 4  ;;  %v3191_v16 = vld [vmem:[%s4941_s2 + $0x40] ss:$8 sps:$4 sm:$0xff]  }
  0x33   : > { %1711 = vrot.lane.b32.xlu0 %v3045_v21, %s3374_s13  ;;  %v853_v28 = vor.u32 %v852_v22, %v3506_v35  ;;  %v516_v29 = vshll.u32 %v326_v17, 16  ;;  %v908_v30 = vshrl.u32 %v372_v46, 16  ;;  %v914_v31 = vshll.u32 %v373_v20, 16  ;;  %v3606_v21 = vld [vmem:[%s3438_s30 + $0xf8] sm:$0xf] }
  0x34   : > { %v3555_v32 = vsel %vm3459_vm2, %v902_v24, %v906_v8  ;;  %v503_v33 = vor.u32 %v502_v25, %v498_v52  ;;  %v513_v37 = vor.u32 %v512_v27, %v508_v26  ;;  %v918_v39 = vshrl.u32 %v373_v20, 16 }
  0x35   : > { %v3063_v40 = vcombine.low %v3549_v13, %v3555_v32  ;;  %v854_v41 = vrot.slane %v853_v28, 4  ;;  %v518_v42 = vrot.slane %v516_v29, 5  ;;  %v910_v44 = vrot.slane %v908_v30, 4  ;;  %v330_v30 = vld [vmem:[%s3438_s30 + $0x3c] sm:$0x1] }
  0x36   : > { %v504_v35 = vrot.slane %v503_v33, 4  ;;  %v514_v45 = vrot.slane %v513_v37, 4  ;;  %v916_v46 = vrot.slane %v914_v31, 5  ;;  %v920_v47 = vrot.slane %v918_v39, 4  ;;  %v3192_v31 = vld [vmem:[%s4941_s2 + $0x54] ss:$8 sps:$4 sm:$0xff]  }
  0x37   : > { %1747 = vrot.lane.b32.xlu1 %v3063_v40, %s3374_s13  ;;  %1558 = vrot.lane.b32.xlu0 %v3493_v9, %s3374_s13  ;;  %v3566_v49 = vsel %vm3459_vm2, %v854_v41, %v858_v23  ;;  %v911_v51 = vor.u32 %v910_v44, %v906_v8  ;;  %v924_v52 = vshll.u32 %v374_v38, 16  ;;  %v2992_v53 = vcombine.low %v3517_v43, %v3549_v13  ;;  %v3189_v8 = vld [vmem:[%s4941_s2 + $0x44] ss:$8 sps:$4 sm:$0xff]   ;;  %v331_v40 = vld [vmem:[%s3438_s30 + $0x40] sm:$0xf] }
  0x38   : > { %v2991_v56 = vcombine.low %v3566_v49, %v3511_v36  ;;  %v3575_v57 = vsel %vm3459_vm2, %v504_v35, %v508_v26  ;;  %v3579_v9 = vsel %vm3459_vm2, %v514_v45, %v518_v42  ;;  %v921_v61 = vor.u32 %v920_v47, %v916_v46  ;;  %2282 = vmatprep.subr.bf16.mxu0 %v3189_v8  ;;  %v3628_v41 = vld [vmem:[%s3438_s30 + $0x44] sm:$0xf] }
  0x39   : > { %v3046_v63 = vcombine.low %v3575_v57, %v3579_v9  ;;  %v912_v1 = vrot.slane %v911_v51, 4  ;;  %v926_v2 = vrot.slane %v924_v52, 5  ;;  %v521_v3 = vshrl.u32 %v327_v48, 16  ;;  %3120 = vmatprep.subr.bf16.mxu1 %v3189_v8  ;;  %2283 = vmatpush1.bf16.msra.mxu0 %v3191_v16 }
  0x3a   : > { %v922_v36 = vrot.slane %v921_v61, 4  ;;  %v524_v5 = vshll.u32 %v327_v48, 16  ;;  %v530_v6 = vshll.u32 %v328_v55, 16  ;;  %v534_v7 = vshrl.u32 %v328_v55, 16  ;;  %3136 = vmatpush1.bf16.msra.mxu1 %v3191_v16  ;;  %2284 = vmatprep.subr.bf16.mxu0 %v3192_v31 }
  0x3b   : > { %1594 = vrot.lane.b32.xlu1 %v2991_v56, %s3374_s13  ;;  %1713 = vrot.lane.b32.xlu0 %v3046_v63, %s3374_s13  ;;  %v3595_v10 = vsel %vm3459_vm2, %v912_v1, %v916_v46  ;;  %v523_v11 = vrot.slane %v521_v3, 4  ;;  %v540_v12 = vshll.u32 %v3582_v62, 16  ;;  %v929_v14 = vshrl.u32 %v375_v58, 16  ;;  %v378_v46 = vld [vmem:[%s3438_s30 + $0xfc] sm:$0x1] }
  0x3c   : > { %v3603_v17 = vsel %vm3459_vm2, %v922_v36, %v926_v2  ;;  %v526_v18 = vrot.slane %v524_v5, 5  ;;  %v532_v19 = vrot.slane %v530_v6, 5  ;;  %v536_v20 = vrot.slane %v534_v7, 4  ;;  %3121 = vmatprep.subr.bf16.mxu1 %v3192_v31  ;;  %v379_v56 = vld [vmem:[%s3438_s30 + $0x100] sm:$0xf] }
  0x3d   : > { %v3064_v22 = vcombine.low %v3595_v10, %v3603_v17  ;;  %v3610_v23 = vrot.slane %v540_v12, 5  ;;  %v931_v24 = vrot.slane %v929_v14, 4  ;;  %v932_v25 = vshll.u32 %v375_v58, 16  ;;  %v3197_v1 = vld [vmem:[%s4941_s2 + $0x60] ss:$8 sps:$4 sm:$0xff]  }
  0x3e   : > { %v527_v26 = vor.u32 %v526_v18, %v523_v11  ;;  %v537_v27 = vor.u32 %v536_v20, %v532_v19  ;;  %v938_v28 = vshll.u32 %v376_v4, 16  ;;  %v942_v29 = vshrl.u32 %v376_v4, 16  ;;  %v3198_v7 = vld [vmem:[%s4941_s2 + $0x74] ss:$8 sps:$4 sm:$0xff]   ;;  %v3200_v31 = vld [vmem:[%s4941_s2 + $0x70] ss:$8 sps:$4 sm:$0xff]  }
  0x3f   : > { %1749 = vrot.lane.b32.xlu1 %v3064_v22, %s3374_s13  ;;  %1560 = vrot.lane.b32.xlu0 %v2974_v59, %s3374_s13  ;;  %v934_v33 = vrot.slane %v932_v25, 5  ;;  %v948_v37 = vshll.u32 %v3606_v21, 16  ;;  %v2975_v38 = vcombine.low %v3541_v15, %v3575_v57  ;;  %v2993_v39 = vcombine.low %v3555_v32, %v3595_v10  ;;  %v3194_v15 = vld [vmem:[%s4941_s2 + $0x50] ss:$8 sps:$4 sm:$0xff]   ;;  %v3195_v57 = vld [vmem:[%s4941_s2 + $0x64] ss:$8 sps:$4 sm:$0xff]  }
  0x40   : > { %v528_v42 = vrot.slane %v527_v26, 4  ;;  %v538_v44 = vrot.slane %v537_v27, 4  ;;  %v940_v35 = vrot.slane %v938_v28, 5  ;;  %v944_v45 = vrot.slane %v942_v29, 4  ;;  %2285 = vmatpush1.bf16.msra.mxu0 %v3194_v15  ;;  %3137 = vmatpush1.bf16.msra.mxu1 %v3194_v15  ;;  %v334_v26 = vld [vmem:[%s3438_s30 + $0x4c] sm:$0x1] }
  0x41   : > { %v935_v50 = vor.u32 %v934_v33, %v931_v24  ;;  %v950_v54 = vrot.slane %v948_v37, 5  ;;  %v544_v59 = vshrl.u32 %v3582_v62, 16  ;;  %v550_v47 = vshll.u32 %v330_v30, 16  ;;  %2286 = vmatprep.subr.bf16.mxu0 %v3195_v57  ;;  %3122 = vmatprep.subr.bf16.mxu1 %v3195_v57  ;;  %v3201_v33 = vld [vmem:[%s4941_s2 + $0x84] ss:$8 sps:$4 sm:$0xff]  }
  0x42   : > { %v3637_v48 = vsel %vm3459_vm2, %v528_v42, %v532_v19  ;;  %v3642_v51 = vsel %vm3459_vm2, %v538_v44, %v3610_v23  ;;  %v945_v52 = vor.u32 %v944_v45, %v940_v35  ;;  %v555_v55 = vshrl.u32 %v331_v40, 16  ;;  %v381_v44 = vld [vmem:[%s3438_s30 + $0x108] sm:$0xf] }
  0x43   : > { %1596 = vrot.lane.b32.xlu1 %v2992_v53, %s3374_s13  ;;  %v3047_v61 = vcombine.low %v3637_v48, %v3642_v51  ;;  %v936_v62 = vrot.slane %v935_v50, 4  ;;  %v546_v58 = vrot.slane %v544_v59, 4  ;;  %v552_v63 = vrot.slane %v550_v47, 5  ;;  %v380_v53 = vld [vmem:[%s3438_s30 + $0x104] sm:$0xf] }
  0x44   : > { %v946_v2 = vrot.slane %v945_v52, 4  ;;  %v557_v3 = vrot.slane %v555_v55, 4  ;;  %v558_v4 = vshll.u32 %v331_v40, 16  ;;  %v564_v36 = vshll.u32 %v3628_v41, 16  ;;  %2287 = vmatpush1.bf16.msra.mxu0 %v3197_v1  ;;  %3138 = vmatpush1.bf16.msra.mxu1 %v3197_v1  ;;  %v382_v47 = vld [vmem:[%s3438_s30 + $0x10c] sm:$0x1] }
  0x45   : > { %1715 = vrot.lane.b32.xlu0 %v3047_v61, %s3374_s13  ;;  %v3661_v43 = vsel %vm3459_vm2, %v936_v62, %v940_v35  ;;  %v547_v13 = vor.u32 %v546_v58, %v3610_v23  ;;  %v952_v5 = vshrl.u32 %v3606_v21, 16  ;;  %v958_v6 = vshll.u32 %v378_v46, 16  ;;  %v333_v21 = vld [vmem:[%s3438_s30 + $0x48] sm:$0xf]  ;;  %2288 = vmatprep.subr.bf16.mxu0 %v3198_v7 }
  0x46   : > { %v3671_v8 = vsel %vm3459_vm2, %v946_v2, %v950_v54  ;;  %v560_v11 = vrot.slane %v558_v4, 5  ;;  %v566_v12 = vrot.slane %v564_v36, 5  ;;  %v963_v14 = vshrl.u32 %v379_v56, 16  ;;  %3123 = vmatprep.subr.bf16.mxu1 %v3198_v7  ;;  %v3203_v46 = vld [vmem:[%s4941_s2 + $0x80] ss:$8 sps:$4 sm:$0xff]  }
  0x47   : > { %v3065_v16 = vcombine.low %v3661_v43, %v3671_v8  ;;  %v548_v18 = vrot.slane %v547_v13, 4  ;;  %v954_v19 = vrot.slane %v952_v5, 4  ;;  %v960_v20 = vrot.slane %v958_v6, 5  ;;  %v335_v13 = vld [vmem:[%s3438_s30 + $0x50] sm:$0xf] }
  0x48   : > { %v561_v22 = vor.u32 %v560_v11, %v557_v3  ;;  %v965_v23 = vrot.slane %v963_v14, 4  ;;  %v966_v24 = vshll.u32 %v379_v56, 16  ;;  %v972_v25 = vshll.u32 %v380_v53, 16  ;;  %2289 = vmatpush1.bf16.msra.mxu0 %v3200_v31  ;;  %3139 = vmatpush1.bf16.msra.mxu1 %v3200_v31  ;;  %v3206_v5 = vld [vmem:[%s4941_s2 + $0x90] ss:$8 sps:$4 sm:$0xff]  }
  0x49   : > { %1751 = vrot.lane.b32.xlu1 %v3065_v16, %s3374_s13  ;;  %1562 = vrot.lane.b32.xlu0 %v2975_v38, %s3374_s13  ;;  %v3681_v27 = vsel %vm3459_vm2, %v548_v18, %v552_v63  ;;  %v955_v28 = vor.u32 %v954_v19, %v950_v54  ;;  %v2976_v29 = vcombine.low %v3579_v9, %v3637_v48  ;;  %v568_v30 = vshrl.u32 %v3628_v41, 16  ;;  %v3204_v48 = vld [vmem:[%s4941_s2 + $0x94] ss:$8 sps:$4 sm:$0xff]   ;;  %v3735_v14 = vld [vmem:[%s3438_s30 + $0x58] sm:$0xf] }
  0x4a   : > { %v562_v37 = vrot.slane %v561_v22, 4  ;;  %v968_v38 = vrot.slane %v966_v24, 5  ;;  %v974_v40 = vrot.slane %v972_v25, 5  ;;  %v2994_v42 = vcombine.low %v3603_v17, %v3661_v43  ;;  %2290 = vmatprep.subr.bf16.mxu0 %v3201_v33  ;;  %3124 = vmatprep.subr.bf16.mxu1 %v3201_v33  ;;  %v3207_v16 = vld [vmem:[%s4941_s2 + $0xa4] ss:$8 sps:$4 sm:$0xff]  }
  0x4b   : > { %v956_v9 = vrot.slane %v955_v28, 4  ;;  %v570_v35 = vrot.slane %v568_v30, 4  ;;  %v574_v41 = vshll.u32 %v333_v21, 16  ;;  %v578_v45 = vshrl.u32 %v333_v21, 16  ;;  %v3212_v17 = vld [vmem:[%s4941_s2 + $0xb0] ss:$8 sps:$4 sm:$0xff]  }
  0x4c   : > { %v3700_v50 = vsel %vm3459_vm2, %v562_v37, %v566_v12  ;;  %v969_v54 = vor.u32 %v968_v38, %v965_v23  ;;  %v584_v59 = vshll.u32 %v334_v26, 16  ;;  %v976_v15 = vshrl.u32 %v380_v53, 16  ;;  %2291 = vmatpush1.bf16.msra.mxu0 %v3203_v46  ;;  %v336_v53 = vld [vmem:[%s3438_s30 + $0x54] sm:$0xf]  ;;  %3140 = vmatpush1.bf16.msra.mxu1 %v3203_v46  ;;  %v383_v26 = vld [vmem:[%s3438_s30 + $0x110] sm:$0xf] }
  0x4d   : > { %1598 = vrot.lane.b32.xlu1 %v2993_v39, %s3374_s13  ;;  %v3048_v52 = vcombine.low %v3681_v27, %v3700_v50  ;;  %v3714_v55 = vsel %vm3459_vm2, %v956_v9, %v960_v20  ;;  %v571_v56 = vor.u32 %v570_v35, %v566_v12  ;;  %v576_v57 = vrot.slane %v574_v41, 5  ;;  %2292 = vmatprep.subr.bf16.mxu0 %v3204_v48  ;;  %v384_v37 = vld [vmem:[%s3438_s30 + $0x114] sm:$0xf] }
  0x4e   : > { %v970_v61 = vrot.slane %v969_v54, 4  ;;  %v580_v62 = vrot.slane %v578_v45, 4  ;;  %v586_v58 = vrot.slane %v584_v59, 5  ;;  %v978_v63 = vrot.slane %v976_v15, 4  ;;  %3125 = vmatprep.subr.bf16.mxu1 %v3204_v48  ;;  %v3210_v35 = vld [vmem:[%s4941_s2 + $0xb4] ss:$8 sps:$4 sm:$0xff]  }
  0x4f   : > { %1717 = vrot.lane.b32.xlu0 %v3048_v52, %s3374_s13  ;;  %v572_v32 = vrot.slane %v571_v56, 4  ;;  %v982_v10 = vshll.u32 %v381_v44, 16  ;;  %v986_v39 = vshrl.u32 %v381_v44, 16  ;;  %v992_v1 = vshll.u32 %v382_v47, 16  ;;  %v3766_v54 = vld [vmem:[%s3438_s30 + $0x118] sm:$0xf] }
  0x50   : > { %v3719_v2 = vsel %vm3459_vm2, %v970_v61, %v974_v40  ;;  %v581_v3 = vor.u32 %v580_v62, %v576_v57  ;;  %v979_v4 = vor.u32 %v978_v63, %v974_v40  ;;  %v2977_v36 = vcombine.low %v3642_v51, %v3681_v27  ;;  %2293 = vmatpush1.bf16.msra.mxu0 %v3206_v5  ;;  %v338_v56 = vld [vmem:[%s3438_s30 + $0x5c] sm:$0x1]  ;;  %v339_v63 = vld [vmem:[%s3438_s30 + $0x60] sm:$0xf] }
  0x51   : > { %v3066_v6 = vcombine.low %v3714_v55, %v3719_v2  ;;  %v3732_v7 = vsel %vm3459_vm2, %v572_v32, %v576_v57  ;;  %v984_v11 = vrot.slane %v982_v10, 5  ;;  %v988_v12 = vrot.slane %v986_v39, 4  ;;  %2294 = vmatprep.subr.bf16.mxu0 %v3207_v16  ;;  %3141 = vmatpush1.bf16.msra.mxu1 %v3206_v5  ;;  %v3213_v39 = vld [vmem:[%s4941_s2 + $0xc4] ss:$8 sps:$4 sm:$0xff]  }
  0x52   : > { %v582_v18 = vrot.slane %v581_v3, 4  ;;  %v980_v19 = vrot.slane %v979_v4, 4  ;;  %v994_v20 = vrot.slane %v992_v1, 5  ;;  %v2995_v21 = vcombine.low %v3671_v8, %v3714_v55  ;;  %3126 = vmatprep.subr.bf16.mxu1 %v3207_v16 }
  0x53   : > { %1753 = vrot.lane.b32.xlu1 %v3066_v6, %s3374_s13  ;;  %1564 = vrot.lane.b32.xlu0 %v2976_v29, %s3374_s13  ;;  %v989_v22 = vor.u32 %v988_v12, %v984_v11  ;;  %v589_v23 = vshrl.u32 %v335_v13, 16  ;;  %v592_v24 = vshll.u32 %v335_v13, 16  ;;  %v598_v25 = vshll.u32 %v336_v53, 16  ;;  %v3209_v29 = vld [vmem:[%s4941_s2 + $0xa0] ss:$8 sps:$4 sm:$0xff]  }
  0x54   : > { %v3747_v28 = vsel %vm3459_vm2, %v582_v18, %v586_v58  ;;  %v3751_v30 = vsel %vm3459_vm2, %v980_v19, %v984_v11  ;;  %v602_v31 = vshrl.u32 %v336_v53, 16  ;;  %v608_v33 = vshll.u32 %v3735_v14, 16  ;;  %2295 = vmatpush1.bf16.msra.mxu0 %v3209_v29  ;;  %v3804_v11 = vld [vmem:[%s3438_s30 + $0x64] sm:$0xf]  ;;  %v3215_v18 = vld [vmem:[%s4941_s2 + $0xc0] ss:$8 sps:$4 sm:$0xff]  }
  0x55   : > { %v3049_v38 = vcombine.low %v3732_v7, %v3747_v28  ;;  %v990_v40 = vrot.slane %v989_v22, 4  ;;  %v591_v44 = vrot.slane %v589_v23, 4  ;;  %v594_v9 = vrot.slane %v592_v24, 5  ;;  %2296 = vmatprep.subr.bf16.mxu0 %v3210_v35  ;;  %3142 = vmatpush1.bf16.msra.mxu1 %v3209_v29  ;;  %v3216_v23 = vld [vmem:[%s4941_s2 + $0xd4] ss:$8 sps:$4 sm:$0xff]  }
  0x56   : > { %v600_v41 = vrot.slane %v598_v25, 5  ;;  %v604_v45 = vrot.slane %v602_v31, 4  ;;  %v3763_v46 = vrot.slane %v608_v33, 5  ;;  %v997_v59 = vshrl.u32 %v383_v26, 16  ;;  %3127 = vmatprep.subr.bf16.mxu1 %v3210_v35 }
  0x57   : > { %1600 = vrot.lane.b32.xlu1 %v2994_v42, %s3374_s13  ;;  %1719 = vrot.lane.b32.xlu0 %v3049_v38, %s3374_s13  ;;  %v3775_v47 = vsel %vm3459_vm2, %v990_v40, %v994_v20  ;;  %v595_v15 = vor.u32 %v594_v9, %v591_v44  ;;  %v1000_v48 = vshll.u32 %v383_v26, 16  ;;  %v1006_v52 = vshll.u32 %v384_v37, 16  ;;  %v388_v38 = vld [vmem:[%s3438_s30 + $0x124] sm:$0xf] }
  0x58   : > { %v3067_v57 = vcombine.low %v3751_v30, %v3775_v47  ;;  %v605_v61 = vor.u32 %v604_v45, %v600_v41  ;;  %v999_v62 = vrot.slane %v997_v59, 4  ;;  %v1010_v58 = vshrl.u32 %v384_v37, 16  ;;  %2297 = vmatpush1.bf16.msra.mxu0 %v3212_v17 }
  0x59   : > { %v596_v43 = vrot.slane %v595_v15, 4  ;;  %v1002_v42 = vrot.slane %v1000_v48, 5  ;;  %v1008_v32 = vrot.slane %v1006_v52, 5  ;;  %v1016_v10 = vshll.u32 %v3766_v54, 16  ;;  %2298 = vmatprep.subr.bf16.mxu0 %v3213_v39  ;;  %3143 = vmatpush1.bf16.msra.mxu1 %v3212_v17  ;;  %v389_v17 = vld [vmem:[%s3438_s30 + $0x128] sm:$0xf] }
  0x5a   : > { %v606_v1 = vrot.slane %v605_v61, 4  ;;  %v1012_v3 = vrot.slane %v1010_v58, 4  ;;  %v2978_v4 = vcombine.low %v3700_v50, %v3732_v7  ;;  %v2996_v13 = vcombine.low %v3719_v2, %v3751_v30  ;;  %v386_v7 = vld [vmem:[%s3438_s30 + $0x11c] sm:$0x1]  ;;  %3128 = vmatprep.subr.bf16.mxu1 %v3213_v39  ;;  %v3221_v39 = vld [vmem:[%s4941_s2 + $0xe0] ss:$8 sps:$4 sm:$0xff]  }
  0x5b   : > { %1755 = vrot.lane.b32.xlu1 %v3067_v57, %s3374_s13  ;;  %1566 = vrot.lane.b32.xlu0 %v2977_v36, %s3374_s13  ;;  %v3799_v53 = vsel %vm3459_vm2, %v596_v43, %v600_v41  ;;  %v1003_v5 = vor.u32 %v1002_v42, %v999_v62  ;;  %v3801_v6 = vrot.slane %v1016_v10, 5  ;;  %v612_v50 = vshrl.u32 %v3735_v14, 16  ;;  %v387_v36 = vld [vmem:[%s3438_s30 + $0x120] sm:$0xf]  ;;  %v3224_v2 = vld [vmem:[%s4941_s2 + $0xf0] ss:$8 sps:$4 sm:$0xff]  }
  0x5c   : > { %v3811_v12 = vsel %vm3459_vm2, %v606_v1, %v3763_v46  ;;  %v1013_v16 = vor.u32 %v1012_v3, %v1008_v32  ;;  %v618_v51 = vshll.u32 %v338_v56, 16  ;;  %v623_v27 = vshrl.u32 %v339_v63, 16  ;;  %2299 = vmatpush1.bf16.msra.mxu0 %v3215_v18  ;;  %v341_v56 = vld [vmem:[%s3438_s30 + $0x68] sm:$0xf] }
  0x5d   : > { %v3050_v19 = vcombine.low %v3799_v53, %v3811_v12  ;;  %v1004_v20 = vrot.slane %v1003_v5, 4  ;;  %v614_v14 = vrot.slane %v612_v50, 4  ;;  %v626_v22 = vshll.u32 %v339_v63, 16  ;;  %2300 = vmatprep.subr.bf16.mxu0 %v3216_v23  ;;  %3144 = vmatpush1.bf16.msra.mxu1 %v3215_v18  ;;  %v342_v63 = vld [vmem:[%s3438_s30 + $0x6c] sm:$0x1] }
  0x5e   : > { %v1014_v24 = vrot.slane %v1013_v16, 4  ;;  %v620_v25 = vrot.slane %v618_v51, 5  ;;  %v625_v26 = vrot.slane %v623_v27, 4  ;;  %v632_v31 = vshll.u32 %v3804_v11, 16  ;;  %3129 = vmatprep.subr.bf16.mxu1 %v3216_v23 }
  0x5f   : > { %1602 = vrot.lane.b32.xlu1 %v2995_v21, %s3374_s13  ;;  %1721 = vrot.lane.b32.xlu0 %v3050_v19, %s3374_s13  ;;  %v3830_v33 = vsel %vm3459_vm2, %v1004_v20, %v1008_v32  ;;  %v615_v37 = vor.u32 %v614_v14, %v3763_v46  ;;  %v628_v29 = vrot.slane %v626_v22, 5  ;;  %v1020_v40 = vshrl.u32 %v3766_v54, 16  ;;  %v3218_v21 = vld [vmem:[%s4941_s2 + $0xd0] ss:$8 sps:$4 sm:$0xff]   ;;  %v3219_v54 = vld [vmem:[%s4941_s2 + $0xe4] ss:$8 sps:$4 sm:$0xff]  }
  0x60   : > { %v3838_v44 = vsel %vm3459_vm2, %v1014_v24, %v3801_v6  ;;  %v3840_v9 = vrot.slane %v632_v31, 5  ;;  %v1026_v8 = vshll.u32 %v386_v7, 16  ;;  %v1031_v55 = vshrl.u32 %v387_v36, 16  ;;  %2301 = vmatpush1.bf16.msra.mxu0 %v3218_v21  ;;  %v390_v7 = vld [vmem:[%s3438_s30 + $0x12c] sm:$0x1] }
  0x61   : > { %v3068_v35 = vcombine.low %v3830_v33, %v3838_v44  ;;  %v616_v41 = vrot.slane %v615_v37, 4  ;;  %v629_v45 = vor.u32 %v628_v29, %v625_v26  ;;  %v1022_v46 = vrot.slane %v1020_v40, 4  ;;  %2302 = vmatprep.subr.bf16.mxu0 %v3219_v54  ;;  %3145 = vmatpush1.bf16.msra.mxu1 %v3218_v21  ;;  %v343_v24 = vld [vmem:[%s3438_s30 + $0x70] sm:$0xf] }
  0x62   : > { %v1028_v59 = vrot.slane %v1026_v8, 5  ;;  %v1033_v15 = vrot.slane %v1031_v55, 4  ;;  %v1034_v48 = vshll.u32 %v387_v36, 16  ;;  %v1040_v52 = vshll.u32 %v388_v38, 16  ;;  %3130 = vmatprep.subr.bf16.mxu1 %v3219_v54  ;;  %v344_v8 = vld [vmem:[%s3438_s30 + $0x74] sm:$0xf] }
  0x63   : > { %1757 = vrot.lane.b32.xlu1 %v3068_v35, %s3374_s13  ;;  %1568 = vrot.lane.b32.xlu0 %v2978_v4, %s3374_s13  ;;  %v3855_v57 = vsel %vm3459_vm2, %v616_v41, %v620_v25  ;;  %v630_v61 = vrot.slane %v629_v45, 4  ;;  %v1023_v62 = vor.u32 %v1022_v46, %v3801_v6  ;;  %v2979_v58 = vcombine.low %v3747_v28, %v3799_v53  ;;  %v3222_v53 = vld [vmem:[%s4941_s2 + $0xf4] ss:$8 sps:$4 sm:$0xff]   ;;  %v345_v35 = vld [vmem:[%s3438_s30 + $0x78] sm:$0xf] }
  0x64   : > { %v1036_v43 = vrot.slane %v1034_v48, 5  ;;  %v1042_v42 = vrot.slane %v1040_v52, 5  ;;  %v2997_v32 = vcombine.low %v3775_v47, %v3830_v33  ;;  %v636_v10 = vshrl.u32 %v3804_v11, 16  ;;  %2303 = vmatpush1.bf16.msra.mxu0 %v3221_v39  ;;  %v347_v33 = vld [vmem:[%s3438_s30 + $0x80] sm:$0xf] }
  0x65   : > { %v3871_v1 = vsel %vm3459_vm2, %v630_v61, %v3840_v9  ;;  %v1024_v28 = vrot.slane %v1023_v62, 4  ;;  %v642_v3 = vshll.u32 %v341_v56, 16  ;;  %v646_v4 = vshrl.u32 %v341_v56, 16  ;;  %2304 = vmatprep.subr.bf16.mxu0 %v3222_v53  ;;  %3146 = vmatpush1.bf16.msra.mxu1 %v3221_v39  ;;  %v392_v61 = vld [vmem:[%s3438_s30 + $0x134] sm:$0xf] }
  0x66   : > { %v3051_v5 = vcombine.low %v3855_v57, %v3871_v1  ;;  %v1037_v6 = vor.u32 %v1036_v43, %v1033_v15  ;;  %v638_v11 = vrot.slane %v636_v10, 4  ;;  %v652_v50 = vshll.u32 %v342_v63, 16  ;;  %3131 = vmatprep.subr.bf16.mxu1 %v3222_v53  ;;  %v391_v15 = vld [vmem:[%s3438_s30 + $0x130] sm:$0xf]  ;;  %v393_v10 = vld [vmem:[%s3438_s30 + $0x138] sm:$0xf] }
  0x67   : > { %1604 = vrot.lane.b32.xlu1 %v2996_v13, %s3374_s13  ;;  %v3885_v16 = vsel %vm3459_vm2, %v1024_v28, %v1028_v59  ;;  %v644_v51 = vrot.slane %v642_v3, 5  ;;  %v648_v27 = vrot.slane %v646_v4, 4  ;;  %v1044_v36 = vshrl.u32 %v388_v38, 16 }
  0x68   : > { %1723 = vrot.lane.b32.xlu0 %v3051_v5, %s3374_s13  ;;  %v1038_v18 = vrot.slane %v1037_v6, 4  ;;  %v639_v19 = vor.u32 %v638_v11, %v3840_v9  ;;  %v654_v20 = vrot.slane %v652_v50, 5  ;;  %v1050_v14 = vshll.u32 %v389_v17, 16  ;;  %2305 = vmatpush1.bf16.msra.mxu0 %v3224_v2 }
  0x69   : > { %v649_v30 = vor.u32 %v648_v27, %v644_v51  ;;  %v1046_v13 = vrot.slane %v1044_v36, 4  ;;  %v1054_v22 = vshrl.u32 %v389_v17, 16  ;;  %v1060_v23 = vshll.u32 %v390_v7, 16  ;;  %3147 = vmatpush1.bf16.msra.mxu1 %v3224_v2 }
  0x6a   : > { %v3895_v25 = vsel %vm3459_vm2, %v1038_v18, %v1042_v42  ;;  %v640_v26 = vrot.slane %v639_v19, 4  ;;  %v1052_v31 = vrot.slane %v1050_v14, 5  ;;  %v2980_v37 = vcombine.low %v3811_v12, %v3855_v57 }
  0x6b   : > { %v3069_v29 = vcombine.low %v3885_v16, %v3895_v25  ;;  %v650_v38 = vrot.slane %v649_v30, 4  ;;  %v1047_v40 = vor.u32 %v1046_v13, %v1042_v42  ;;  %v1056_v9 = vrot.slane %v1054_v22, 4  ;;  %v348_v22 = vld [vmem:[%s3438_s30 + $0x84] sm:$0xf] }
  0x6c   : > { %1570 = vrot.lane.b32.xlu0 %v2979_v58, %s3374_s13  ;;  %v3905_v55 = vsel %vm3459_vm2, %v640_v26, %v644_v51  ;;  %v1062_v21 = vrot.slane %v1060_v23, 5  ;;  %v2998_v12 = vcombine.low %v3838_v44, %v3885_v16  ;;  %v657_v41 = vshrl.u32 %v343_v24, 16  ;;  %v346_v51 = vld [vmem:[%s3438_s30 + $0x7c] sm:$0x1] }
  0x6d   : > { %1759 = vrot.lane.b32.xlu1 %v3069_v29, %s3374_s13  ;;  %v3913_v45 = vsel %vm3459_vm2, %v650_v38, %v654_v20  ;;  %v1048_v46 = vrot.slane %v1047_v40, 4  ;;  %v1057_v54 = vor.u32 %v1056_v9, %v1052_v31  ;;  %v660_v59 = vshll.u32 %v343_v24, 16  ;;  %v394_v9 = vld [vmem:[%s3438_s30 + $0x13c] sm:$0x1] }
  0x6e   : > { %v3052_v48 = vcombine.low %v3905_v55, %v3913_v45  ;;  %v659_v52 = vrot.slane %v657_v41, 4  ;;  %v666_v56 = vshll.u32 %v344_v8, 16  ;;  %v670_v57 = vshrl.u32 %v344_v8, 16  ;;  %v3956_v8 = vld [vmem:[%s3438_s30 + $0x140] sm:$0xf] }
  0x6f   : > { %v3921_v62 = vsel %vm3459_vm2, %v1048_v46, %v1052_v31  ;;  %v1058_v58 = vrot.slane %v1057_v54, 4  ;;  %v662_v63 = vrot.slane %v660_v59, 5  ;;  %v676_v17 = vshll.u32 %v345_v35, 16 }
  0x70   : > { %1725 = vrot.lane.b32.xlu0 %v3052_v48, %s3374_s13  ;;  %v668_v43 = vrot.slane %v666_v56, 5  ;;  %v672_v42 = vrot.slane %v670_v57, 4  ;;  %v1065_v39 = vshrl.u32 %v391_v15, 16  ;;  %v1068_v28 = vshll.u32 %v391_v15, 16 }
  0x71   : > { %1606 = vrot.lane.b32.xlu1 %v2997_v32, %s3374_s13  ;;  %v3931_v3 = vsel %vm3459_vm2, %v1058_v58, %v1062_v21  ;;  %v663_v4 = vor.u32 %v662_v63, %v659_v52  ;;  %v678_v53 = vrot.slane %v676_v17, 5  ;;  %v1074_v5 = vshll.u32 %v392_v61, 16  ;;  %v3968_v52 = vld [vmem:[%s3438_s30 + $0x144] sm:$0xf] }
  0x72   : > { %v3070_v6 = vcombine.low %v3921_v62, %v3931_v3  ;;  %v673_v11 = vor.u32 %v672_v42, %v668_v43  ;;  %v1067_v50 = vrot.slane %v1065_v39, 4  ;;  %v1070_v7 = vrot.slane %v1068_v28, 5 }
  0x73   : > { %v664_v27 = vrot.slane %v663_v4, 4  ;;  %v1076_v36 = vrot.slane %v1074_v5, 5  ;;  %v1078_v18 = vshrl.u32 %v392_v61, 16  ;;  %v1084_v47 = vshll.u32 %v393_v10, 16 }
  0x74   : > { %1572 = vrot.lane.b32.xlu0 %v2980_v37, %s3374_s13  ;;  %v674_v32 = vrot.slane %v673_v11, 4  ;;  %v1071_v19 = vor.u32 %v1070_v7, %v1067_v50  ;;  %v2981_v20 = vcombine.low %v3871_v1, %v3905_v55  ;;  %v2999_v14 = vcombine.low %v3895_v25, %v3921_v62  ;;  %v350_v50 = vld [vmem:[%s3438_s30 + $0x8c] sm:$0x1]  ;;  %v4024_v62 = vld [vmem:[%s3438_s30 + $0x90] sm:$0xf] }
  0x75   : > { %1761 = vrot.lane.b32.xlu1 %v3070_v6, %s3374_s13  ;;  %v3945_v2 = vsel %vm3459_vm2, %v664_v27, %v668_v43  ;;  %v1080_v30 = vrot.slane %v1078_v18, 4  ;;  %v1086_v13 = vrot.slane %v1084_v47, 5  ;;  %v680_v23 = vshrl.u32 %v345_v35, 16  ;;  %v3999_v47 = vld [vmem:[%s3438_s30 + $0x148] sm:$0xf] }
  0x76   : > { %v3950_v24 = vsel %vm3459_vm2, %v674_v32, %v678_v53  ;;  %v1072_v1 = vrot.slane %v1071_v19, 4  ;;  %v686_v26 = vshll.u32 %v346_v51, 16  ;;  %v691_v31 = vshrl.u32 %v347_v33, 16 }
  0x77   : > { %v3053_v37 = vcombine.low %v3945_v2, %v3950_v24  ;;  %v1081_v29 = vor.u32 %v1080_v30, %v1076_v36  ;;  %v682_v38 = vrot.slane %v680_v23, 4  ;;  %v694_v40 = vshll.u32 %v347_v33, 16  ;;  %v398_v30 = vld [vmem:[%s3438_s30 + $0x14c] sm:$0x1] }
  0x78   : > { %v3960_v55 = vsel %vm3459_vm2, %v1072_v1, %v1076_v36  ;;  %v688_v21 = vrot.slane %v686_v26, 5  ;;  %v693_v35 = vrot.slane %v691_v31, 4  ;;  %v700_v41 = vshll.u32 %v348_v22, 16 }
  0x79   : > { %1608 = vrot.lane.b32.xlu1 %v2998_v12, %s3374_s13  ;;  %1727 = vrot.lane.b32.xlu0 %v3053_v37, %s3374_s13  ;;  %v1082_v46 = vrot.slane %v1081_v29, 4  ;;  %v683_v54 = vor.u32 %v682_v38, %v678_v53  ;;  %v696_v59 = vrot.slane %v694_v40, 5  ;;  %v1088_v15 = vshrl.u32 %v393_v10, 16  ;;  %v3979_v10 = vld [vmem:[%s3438_s30 + $0x88] sm:$0xf] }
  0x7a   : > { %v702_v48 = vrot.slane %v700_v41, 5  ;;  %v1094_v56 = vshll.u32 %v394_v9, 16  ;;  %v1099_v57 = vshrl.u32 %v3956_v8, 16  ;;  %v1102_v61 = vshll.u32 %v3956_v8, 16 }
  0x7b   : > { %v3974_v58 = vsel %vm3459_vm2, %v1082_v46, %v1086_v13  ;;  %v684_v44 = vrot.slane %v683_v54, 4  ;;  %v697_v16 = vor.u32 %v696_v59, %v693_v35  ;;  %v1090_v12 = vrot.slane %v1088_v15, 4  ;;  %v4034_v54 = vld [vmem:[%s3438_s30 + $0x98] sm:$0xf] }
  0x7c   : > { %v3071_v63 = vcombine.low %v3960_v55, %v3974_v58  ;;  %v1096_v17 = vrot.slane %v1094_v56, 5  ;;  %v1101_v43 = vrot.slane %v1099_v57, 4  ;;  %v1104_v42 = vrot.slane %v1102_v61, 5  ;;  %4954 = vst [vmem:[#allocation2_spill] sm:$0xff] %v4034_v54 }
  0x7d   : > { %1574 = vrot.lane.b32.xlu0 %v2981_v20, %s3374_s13  ;;  %v3984_v39 = vsel %vm3459_vm2, %v684_v44, %v688_v21  ;;  %v698_v28 = vrot.slane %v697_v16, 4  ;;  %v1091_v4 = vor.u32 %v1090_v12, %v1086_v13  ;;  %v1108_v53 = vshll.u32 %v3968_v52, 16  ;;  %v4046_v16 = vld [vmem:[%s3438_s30 + $0x150] sm:$0xf] }
  0x7e   : > { %1763 = vrot.lane.b32.xlu1 %v3071_v63, %s3374_s13  ;;  %v1105_v5 = vor.u32 %v1104_v42, %v1101_v43  ;;  %v2982_v6 = vcombine.low %v3913_v45, %v3945_v2  ;;  %v3000_v11 = vcombine.low %v3931_v3, %v3960_v55  ;;  %v704_v7 = vshrl.u32 %v348_v22, 16  ;;  %v4027_v55 = vld [vmem:[%s3438_s30 + $0x94] sm:$0xf]  ;;  %4955 = vst [vmem:[#allocation3_spill] sm:$0xff] %v4046_v16 }
  0x7f   : > { %v3995_v51 = vsel %vm3459_vm2, %v698_v28, %v702_v48  ;;  %v1092_v27 = vrot.slane %v1091_v4, 4  ;;  %v1110_v36 = vrot.slane %v1108_v53, 5  ;;  %v710_v18 = vshll.u32 %v3979_v10, 16  ;;  %v4055_v42 = vld [vmem:[%s3438_s30 + $0x154] sm:$0xf] }
  0x80   : > { %v3054_v33 = vcombine.low %v3984_v39, %v3995_v51  ;;  %v1106_v45 = vrot.slane %v1105_v5, 4  ;;  %v706_v32 = vrot.slane %v704_v7, 4  ;;  %v714_v19 = vshrl.u32 %v3979_v10, 16  ;;  %4956 = vst [vmem:[#allocation4_spill] sm:$0xff] %v4055_v42  ;;  %v4065_v7 = vld [vmem:[%s3438_s30 + $0x158] sm:$0xf] }
  0x81   : > { %v4006_v3 = vsel %vm3459_vm2, %v1092_v27, %v1096_v17  ;;  %v712_v20 = vrot.slane %v710_v18, 5  ;;  %v720_v2 = vshll.u32 %v350_v50, 16  ;;  %v1112_v13 = vshrl.u32 %v3968_v52, 16 }
  0x82   : > { %1610 = vrot.lane.b32.xlu1 %v2999_v14, %s3374_s13  ;;  %1729 = vrot.lane.b32.xlu0 %v3054_v33, %s3374_s13  ;;  %v4017_v22 = vsel %vm3459_vm2, %v1106_v45, %v1110_v36  ;;  %v707_v23 = vor.u32 %v706_v32, %v702_v48  ;;  %v716_v1 = vrot.slane %v714_v19, 4  ;;  %v1118_v26 = vshll.u32 %v3999_v47, 16 }
  0x83   : > { %v3072_v31 = vcombine.low %v4006_v3, %v4017_v22  ;;  %v722_v37 = vrot.slane %v720_v2, 5  ;;  %v1114_v29 = vrot.slane %v1112_v13, 4  ;;  %v1122_v25 = vshrl.u32 %v3999_v47, 16  ;;  %v354_v2 = vld [vmem:[%s3438_s30 + $0x9c] sm:$0x1] }
  0x84   : > { %v708_v14 = vrot.slane %v707_v23, 4  ;;  %v717_v38 = vor.u32 %v716_v1, %v712_v20  ;;  %v1120_v40 = vrot.slane %v1118_v26, 5  ;;  %v1128_v9 = vshll.u32 %v398_v30, 16  ;;  %v4081_v26 = vld [vmem:[%s3438_s30 + $0xa0] sm:$0xf] }
  0x85   : > { %v1115_v21 = vor.u32 %v1114_v29, %v1110_v36  ;;  %v1124_v35 = vrot.slane %v1122_v25, 4  ;;  %v2983_v41 = vcombine.low %v3950_v24, %v3984_v39  ;;  %v3001_v46 = vcombine.low %v3974_v58, %v4006_v3 }
  0x86   : > { %1765 = vrot.lane.b32.xlu1 %v3072_v31, %s3374_s13  ;;  %1576 = vrot.lane.b32.xlu0 %v2982_v6, %s3374_s13  ;;  %v4040_v59 = vsel %vm3459_vm2, %v708_v14, %v712_v20  ;;  %v718_v15 = vrot.slane %v717_v38, 4  ;;  %v1130_v48 = vrot.slane %v1128_v9, 5  ;;  %v725_v56 = vshrl.u32 %v4024_v62, 16  ;;  %v4094_v9 = vld [vmem:[%s3438_s30 + $0xa4] sm:$0xf] }
  0x87   : > { %v1116_v57 = vrot.slane %v1115_v21, 4  ;;  %v1125_v24 = vor.u32 %v1124_v35, %v1120_v40  ;;  %v728_v61 = vshll.u32 %v4024_v62, 16  ;;  %v734_v44 = vshll.u32 %v4027_v55, 16 }
  0x88   : > { %v4050_v12 = vsel %vm3459_vm2, %v718_v15, %v722_v37  ;;  %v727_v63 = vrot.slane %v725_v56, 4  ;;  %v738_v17 = vshrl.u32 %v4027_v55, 16  ;;  %v744_v43 = vshll.u32 %v4034_v54, 16 }
  0x89   : > { %v3055_v39 = vcombine.low %v4040_v59, %v4050_v12  ;;  %v4061_v28 = vsel %vm3459_vm2, %v1116_v57, %v1120_v40  ;;  %v1126_v4 = vrot.slane %v1125_v24, 4  ;;  %v730_v53 = vrot.slane %v728_v61, 5  ;;  %v4107_v24 = vld [vmem:[%s3438_s30 + $0x160] sm:$0xf] }
  0x8a   : > { %1612 = vrot.lane.b32.xlu1 %v3000_v11, %s3374_s13  ;;  %v736_v5 = vrot.slane %v734_v44, 5  ;;  %v740_v6 = vrot.slane %v738_v17, 4  ;;  %v746_v50 = vrot.slane %v744_v43, 5  ;;  %v1133_v27 = vshrl.u32 %v4046_v16, 16 }
  0x8b   : > { %1731 = vrot.lane.b32.xlu0 %v3055_v39, %s3374_s13  ;;  %v4071_v36 = vsel %vm3459_vm2, %v1126_v4, %v1130_v48  ;;  %v731_v18 = vor.u32 %v730_v53, %v727_v63  ;;  %v1136_v33 = vshll.u32 %v4046_v16, 16  ;;  %v1142_v45 = vshll.u32 %v4055_v42, 16  ;;  %v4120_v4 = vld [vmem:[%s3438_s30 + $0x164] sm:$0xf] }
  0x8c   : > { %v3073_v11 = vcombine.low %v4061_v28, %v4071_v36  ;;  %v741_v32 = vor.u32 %v740_v6, %v736_v5  ;;  %v1135_v19 = vrot.slane %v1133_v27, 4  ;;  %v1146_v20 = vshrl.u32 %v4055_v42, 16  ;;  %v3308_v42 = vld [vmem:[%s3438_s30 + $0x8] sm:$0xf] }
  0x8d   : > { %v732_v30 = vrot.slane %v731_v18, 4  ;;  %v1138_v13 = vrot.slane %v1136_v33, 5  ;;  %v1144_v23 = vrot.slane %v1142_v45, 5  ;;  %v1152_v1 = vshll.u32 %v4065_v7, 16 }
  0x8e   : > { %1767 = vrot.lane.b32.xlu1 %v3073_v11, %s3374_s13  ;;  %v742_v31 = vrot.slane %v741_v32, 4  ;;  %v1148_v37 = vrot.slane %v1146_v20, 4  ;;  %v2984_v29 = vcombine.low %v3995_v51, %v4040_v59  ;;  %v3002_v25 = vcombine.low %v4017_v22, %v4061_v28 }
  0x8f   : > { %1578 = vrot.lane.b32.xlu0 %v2983_v41, %s3374_s13  ;;  %v4091_v14 = vsel %vm3459_vm2, %v732_v30, %v736_v5  ;;  %v1139_v38 = vor.u32 %v1138_v13, %v1135_v19  ;;  %v1154_v40 = vrot.slane %v1152_v1, 5  ;;  %v748_v21 = vshrl.u32 %v4034_v54, 16  ;;  %v402_v41 = vld [vmem:[%s3438_s30 + $0x15c] sm:$0x1]  ;;  %v4133_v19 = vld [vmem:[%s3438_s30 + $0xa8] sm:$0xf] }
  0x90   : > { %v4099_v35 = vsel %vm3459_vm2, %v742_v31, %v746_v50  ;;  %v1149_v51 = vor.u32 %v1148_v37, %v1144_v23  ;;  %v754_v59 = vshll.u32 %v354_v2, 16  ;;  %v759_v22 = vshrl.u32 %v4081_v26, 16 }
  0x91   : > { %v3056_v15 = vcombine.low %v4091_v14, %v4099_v35  ;;  %v1140_v48 = vrot.slane %v1139_v38, 4  ;;  %v750_v56 = vrot.slane %v748_v21, 4  ;;  %v762_v57 = vshll.u32 %v4081_v26, 16 }
  0x92   : > { %1614 = vrot.lane.b32.xlu1 %v3001_v46, %s3374_s13  ;;  %v1150_v61 = vrot.slane %v1149_v51, 4  ;;  %v756_v44 = vrot.slane %v754_v59, 5  ;;  %v761_v63 = vrot.slane %v759_v22, 4  ;;  %v768_v17 = vshll.u32 %v4094_v9, 16  ;;  %v4154_v59 = vld [vmem:[%s3438_s30 + $0x168] sm:$0xf] }
  0x93   : > { %1733 = vrot.lane.b32.xlu0 %v3056_v15, %s3374_s13  ;;  %v4117_v43 = vsel %vm3459_vm2, %v1140_v48, %v1144_v23  ;;  %v751_v39 = vor.u32 %v750_v56, %v746_v50  ;;  %v764_v28 = vrot.slane %v762_v57, 5  ;;  %v1156_v53 = vshrl.u32 %v4065_v7, 16  ;;  %v358_v23 = vld [vmem:[%s3438_s30 + $0xac] sm:$0x1] }
  0x94   : > { %v4125_v58 = vsel %vm3459_vm2, %v1150_v61, %v1154_v40  ;;  %v770_v3 = vrot.slane %v768_v17, 5  ;;  %v1162_v46 = vshll.u32 %v402_v41, 16  ;;  %v1167_v5 = vshrl.u32 %v4107_v24, 16  ;;  %v406_v48 = vld [vmem:[%s3438_s30 + $0x16c] sm:$0x1] }
  0x95   : > { %v3074_v6 = vcombine.low %v4117_v43, %v4125_v58  ;;  %v752_v27 = vrot.slane %v751_v39, 4  ;;  %v765_v50 = vor.u32 %v764_v28, %v761_v63  ;;  %v1158_v18 = vrot.slane %v1156_v53, 4 }
  0x96   : > { %v1164_v33 = vrot.slane %v1162_v46, 5  ;;  %v1169_v45 = vrot.slane %v1167_v5, 4  ;;  %v1170_v11 = vshll.u32 %v4107_v24, 16  ;;  %v1176_v32 = vshll.u32 %v4120_v4, 16 }
  0x97   : > { %1769 = vrot.lane.b32.xlu1 %v3074_v6, %s3374_s13  ;;  %1580 = vrot.lane.b32.xlu0 %v2984_v29, %s3374_s13  ;;  %v4139_v20 = vsel %vm3459_vm2, %v752_v27, %v756_v44  ;;  %v766_v2 = vrot.slane %v765_v50, 4  ;;  %v1159_v30 = vor.u32 %v1158_v18, %v1154_v40  ;;  %v2985_v13 = vcombine.low %v4050_v12, %v4091_v14  ;;  %v1710_v12 = vpop.permute.xlu0 %1709 }
  0x98   : > { %v1172_v1 = vrot.slane %v1170_v11, 5  ;;  %v1178_v31 = vrot.slane %v1176_v32, 5  ;;  %v3003_v37 = vcombine.low %v4071_v36, %v4117_v43  ;;  %v772_v38 = vshrl.u32 %v4094_v9, 16 }
  0x99   : > { %v4149_v29 = vsel %vm3459_vm2, %v766_v2, %v770_v3  ;;  %v1160_v21 = vrot.slane %v1159_v30, 4  ;;  %v778_v51 = vshll.u32 %v4133_v19, 16  ;;  %v782_v40 = vshrl.u32 %v4133_v19, 16 }
  0x9a   : > { %v3057_v14 = vcombine.low %v4139_v20, %v4149_v29  ;;  %v1173_v22 = vor.u32 %v1172_v1, %v1169_v45  ;;  %v774_v41 = vrot.slane %v772_v38, 4  ;;  %v788_v15 = vshll.u32 %v358_v23, 16  ;;  %v1557_v6 = vpop.permute.xlu1 %1556  ;;  %v4176_v45 = vld [vmem:[%s3438_s30 + $0x14] sm:$0xf] }
  0x9b   : > { %1616 = vrot.lane.b32.xlu1 %v3002_v25, %s3374_s13  ;;  %v4162_v56 = vsel %vm3459_vm2, %v1160_v21, %v1164_v33  ;;  %v780_v57 = vrot.slane %v778_v51, 5  ;;  %v784_v61 = vrot.slane %v782_v40, 4  ;;  %v1180_v44 = vshrl.u32 %v4120_v4, 16  ;;  %v4173_v33 = vld [vmem:[%s3438_s30 + $0x10] sm:$0xf] }
  0x9c   : > { %1735 = vrot.lane.b32.xlu0 %v3057_v14, %s3374_s13  ;;  %v1174_v63 = vrot.slane %v1173_v22, 4  ;;  %v775_v17 = vor.u32 %v774_v41, %v770_v3  ;;  %v790_v39 = vrot.slane %v788_v15, 5  ;;  %v1186_v28 = vshll.u32 %v4154_v59, 16  ;;  %v4190_v51 = vld [vmem:[%s3438_s30 + $0xb0] sm:$0xf] }
  0x9d   : > { %v785_v53 = vor.u32 %v784_v61, %v780_v57  ;;  %v1182_v46 = vrot.slane %v1180_v44, 4  ;;  %v1190_v25 = vshrl.u32 %v4154_v59, 16  ;;  %v1196_v5 = vshll.u32 %v406_v48, 16  ;;  %v4199_v22 = vld [vmem:[%s3438_s30 + $0xb4] sm:$0xf] }
  0x9e   : > { %v4170_v27 = vsel %vm3459_vm2, %v1174_v63, %v1178_v31  ;;  %v776_v50 = vrot.slane %v775_v17, 4  ;;  %v1188_v18 = vrot.slane %v1186_v28, 5  ;;  %v3008_v3 = vcombine.low %v4173_v33, %v4176_v45  ;;  %v1746_v23 = vpop.permute.xlu0 %1745  ;;  %v3299_v15 = vld [vmem:[%s3438_s30 + $0x4] sm:$0xf]  ;;  %v4211_v61 = vld [vmem:[%s3438_s30 + $0xd4] sm:$0xf] }
  0x9f   : > { %v3075_v11 = vcombine.low %v4162_v56, %v4170_v27  ;;  %v786_v32 = vrot.slane %v785_v53, 4  ;;  %v1183_v2 = vor.u32 %v1182_v46, %v1178_v31  ;;  %v1192_v30 = vrot.slane %v1190_v25, 4  ;;  %v4216_v44 = vld [vmem:[%s3438_s30 + $0xb8] sm:$0xf]  ;;  %v4225_v46 = vld [vmem:[%s3438_s30 + $0x170] sm:$0xf] }
  0xa0   : > { %1582 = vrot.lane.b32.xlu0 %v2985_v13, %s3374_s13  ;;  %v4185_v1 = vsel %vm3459_vm2, %v776_v50, %v780_v57  ;;  %v1198_v38 = vrot.slane %v1196_v5, 5  ;;  %v2986_v21 = vcombine.low %v4099_v35, %v4139_v20  ;;  %v1928_v14 = vsel %vm1781_vm3, %v3008_v3, %v1710_v12  ;;  %v3298_v20 = vld [vmem:[%s3438_s30] sm:$0xf]  ;;  %v4208_v57 = vld [vmem:[%s3438_s30 + $0xd0] sm:$0xf] }
  0xa1   : > { %1771 = vrot.lane.b32.xlu1 %v3075_v11, %s3374_s13  ;;  %v4195_v13 = vsel %vm3459_vm2, %v786_v32, %v790_v39  ;;  %v1184_v31 = vrot.slane %v1183_v2, 4  ;;  %v1193_v40 = vor.u32 %v1192_v30, %v1188_v18  ;;  %2306 = vmatprep.mubr.bf16.mxu0 %v1928_v14  ;;  %v3004_v35 = vcombine.low %v4125_v58, %v4162_v56  ;;  %v4233_v3 = vld [vmem:[%s3438_s30 + $0x174] sm:$0xf]  ;;  %v4245_v30 = vld [vmem:[%s3438_s30 + $0x178] sm:$0xf] }
  0xa2   : > { %v3058_v41 = vcombine.low %v4185_v1, %v4195_v13  ;;  %v2936_v48 = vcombine.low %v3298_v20, %v3299_v15  ;;  %v3026_v12 = vcombine.low %v4208_v57, %v4211_v61  ;;  %v1593_v39 = vpop.permute.xlu1 %1592  ;;  %v793_v28 = vshrl.u32 %v4190_v51, 16 }
  0xa3   : > { %v4220_v63 = vsel %vm3459_vm2, %v1184_v31, %v1188_v18  ;;  %v1194_v17 = vrot.slane %v1193_v40, 4  ;;  %v796_v53 = vshll.u32 %v4190_v51, 16  ;;  %v802_v50 = vshll.u32 %v4199_v22, 16 }
  0xa4   : > { %1737 = vrot.lane.b32.xlu0 %v3058_v41, %s3374_s13  ;;  %v1784_v25 = vsel %vm1781_vm3, %v2936_v48, %v1557_v6  ;;  %v2000_v5 = vsel %vm1781_vm3, %v3026_v12, %v1746_v23  ;;  %v806_v18 = vshrl.u32 %v4199_v22, 16  ;;  %v795_v6 = vrot.slane %v793_v28, 4 }
  0xa5   : > { %1618 = vrot.lane.b32.xlu1 %v3003_v37, %s3374_s13  ;;  %v4241_v11 = vsel %vm3459_vm2, %v1194_v17, %v1198_v38  ;;  %2307 = vmatmul.mubr.bf16.vlgmr.msra.gmra.mrb[0].mxu0 %v1784_v25  ;;  %v798_v32 = vrot.slane %v796_v53, 5  ;;  %v812_v2 = vshll.u32 %v4216_v44, 16  ;;  %v1712_v23 = vpop.permute.xlu0 %1711  ;;  %v804_v40 = vrot.slane %v802_v50, 5  ;;  %v4261_v25 = vld [vmem:[%s3438_s30 + $0xc0] sm:$0xf] }
  0xa6   : > { %v3076_v31 = vcombine.low %v4220_v63, %v4241_v11  ;;  %2486 = vmatprep.mubr.bf16.mxu1 %v2000_v5  ;;  %v808_v36 = vrot.slane %v806_v18, 4  ;;  %v1201_v43 = vshrl.u32 %v4225_v46, 16  ;;  %v1204_v14 = vshll.u32 %v4225_v46, 16  ;;  %4957 = vst [vmem:[#allocation5_spill] sm:$0xff] %v4261_v25  ;;  %v4264_v5 = vld [vmem:[%s3438_s30 + $0xc4] sm:$0xf] }
  0xa7   : > { %v799_v37 = vor.u32 %v798_v32, %v795_v6  ;;  %v4250_v38 = vrot.slane %v812_v2, 5  ;;  %v1210_v41 = vshll.u32 %v4233_v3, 16  ;;  %v1214_v48 = vshrl.u32 %v4233_v3, 16  ;;  %4958 = vst [vmem:[#allocation6_spill] sm:$0xff] %v4264_v5 }
  0xa8   : > { %1584 = vrot.lane.b32.xlu0 %v2986_v21, %s3374_s13  ;;  %v809_v20 = vor.u32 %v808_v36, %v804_v40  ;;  %v1203_v15 = vrot.slane %v1201_v43, 4  ;;  %v1220_v12 = vshll.u32 %v4245_v30, 16  ;;  %v1206_v28 = vrot.slane %v1204_v14, 5 }
  0xa9   : > { %1773 = vrot.lane.b32.xlu1 %v3076_v31, %s3374_s13  ;;  %v800_v17 = vrot.slane %v799_v37, 4  ;;  %v1212_v53 = vrot.slane %v1210_v41, 5  ;;  %v2954_v21 = vcombine.low %v4261_v25, %v4264_v5  ;;  %v1748_v50 = vpop.permute.xlu1 %1747  ;;  %v1559_v18 = vpop.permute.xlu0 %1558  ;;  %v1216_v32 = vrot.slane %v1214_v48, 4  ;;  %v362_v31 = vld [vmem:[%s3438_s30 + $0xbc] sm:$0x1] }
  0xaa   : > { %v810_v6 = vrot.slane %v809_v20, 4  ;;  %v4268_v2 = vrot.slane %v1220_v12, 5  ;;  %v1207_v43 = vor.u32 %v1206_v28, %v1203_v15  ;;  %v2987_v14 = vcombine.low %v4149_v29, %v4185_v1  ;;  %v4289_v48 = vld [vmem:[%s3438_s30 + $0x18] sm:$0xf]  ;;  %v4292_v12 = vld [vmem:[%s3438_s30 + $0x20] sm:$0xf] }
  0xab   : > { %v4278_v36 = vsel %vm3459_vm2, %v800_v17, %v804_v40  ;;  %v1856_v37 = vsel %vm1781_vm3, %v2954_v21, %v1593_v39  ;;  %v1217_v20 = vor.u32 %v1216_v32, %v1212_v53  ;;  %v3009_v40 = vcombine.low %v4289_v48, %v4292_v12  ;;  %v4297_v39 = vld [vmem:[%s3438_s30 + $0xd8] sm:$0xf]  ;;  %v4300_v15 = vld [vmem:[%s3438_s30 + $0xe0] sm:$0xf]  ;;  %v410_v1 = vld [vmem:[%s3438_s30 + $0x17c] sm:$0x1] }
  0xac   : > { %v4286_v41 = vsel %vm3459_vm2, %v810_v6, %v4250_v38  ;;  %2487 = vmatmul.mubr.bf16.vlgmr.msra.gmra.mrb[0].mxu1 %v1856_v37  ;;  %v3027_v29 = vcombine.low %v4297_v39, %v4300_v15  ;;  %v1208_v28 = vrot.slane %v1207_v43, 4  ;;  %v816_v6 = vshrl.u32 %v4216_v44, 16  ;;  %v4313_v37 = vld [vmem:[%s4274_s6] sm:$0xf]  ;;  %v4325_v43 = vld [vmem:[%s4274_s6 + $0x4] sm:$0xf] }
  0xad   : > { %1620 = vrot.lane.b32.xlu1 %v3004_v35, %s3374_s13  ;;  %v3059_v17 = vcombine.low %v4278_v36, %v4286_v41  ;;  %v1595_v21 = vpop.permute.xlu1 %1594  ;;  %v822_v32 = vshll.u32 %v362_v31, 16  ;;  %v1714_v5 = vpop.permute.xlu0 %1713  ;;  %v1218_v25 = vrot.slane %v1217_v20, 4  ;;  %v1932_v54 = vsel %vm1781_vm3, %v3009_v40, %v1712_v23 }
  0xae   : > { %v2004_v16 = vsel %vm1781_vm3, %v3027_v29, %v1748_v50  ;;  %v2937_v58 = vcombine.low %v3308_v42, %v4173_v33  ;;  %v4322_v56 = vsel %vm3459_vm2, %v1208_v28, %v1212_v53  ;;  %2316 = vmatprep.mubr.bf16.mxu0 %v1932_v54  ;;  %v818_v35 = vrot.slane %v816_v6, 4  ;;  %v4343_v28 = vld [vmem:[%s3438_s30 + $0xc8] sm:$0xf] }
  0xaf   : > { %1739 = vrot.lane.b32.xlu0 %v3059_v17, %s3374_s13  ;;  %v824_v31 = vrot.slane %v822_v32, 5  ;;  %v1224_v20 = vshrl.u32 %v4245_v30, 16  ;;  %v4331_v23 = vsel %vm3459_vm2, %v1218_v25, %v4268_v2  ;;  %2496 = vmatprep.mubr.bf16.mxu1 %v2004_v16  ;;  %v1230_v33 = vshll.u32 %v410_v1, 16 }
  0xb0   : > { %v1788_v42 = vsel %vm1781_vm3, %v2937_v58, %v1559_v18  ;;  %v1235_v53 = vshrl.u32 %v4313_v37, 16  ;;  %v3077_v54 = vcombine.low %v4322_v56, %v4331_v23  ;;  %v819_v50 = vor.u32 %v818_v35, %v4250_v38 }
  0xb1   : > { %2317 = vmatmul.mubr.bf16.gmra.mrb[4].mxu0 %v1788_v42  ;;  %v1226_v40 = vrot.slane %v1224_v20, 4  ;;  %v1238_v29 = vshll.u32 %v4313_v37, 16  ;;  %v1750_v17 = vpop.permute.xlu1 %1749  ;;  %v1561_v25 = vpop.permute.xlu0 %1560  ;;  %v3005_v16 = vcombine.low %v4170_v27, %v4220_v63  ;;  %v1244_v1 = vshll.u32 %v4325_v43, 16  ;;  %v4352_v20 = vld [vmem:[%s3438_s30 + $0x24] sm:$0xf] }
  0xb2   : > { %v1237_v18 = vrot.slane %v1235_v53, 4  ;;  %v2955_v6 = vcombine.low %v4343_v28, %v4208_v57  ;;  %1775 = vrot.lane.b32.xlu1 %v3077_v54, %s3374_s13  ;;  %v820_v38 = vrot.slane %v819_v50, 4  ;;  %v1232_v58 = vrot.slane %v1230_v33, 5  ;;  %v4355_v42 = vld [vmem:[%s3438_s30 + $0x28] sm:$0xf] }
  0xb3   : > { %1586 = vrot.lane.b32.xlu0 %v2987_v14, %s3374_s13  ;;  %v1227_v32 = vor.u32 %v1226_v40, %v4268_v2  ;;  %v1240_v27 = vrot.slane %v1238_v29, 5  ;;  %v1246_v63 = vrot.slane %v1244_v1, 5  ;;  %v3010_v57 = vcombine.low %v4352_v20, %v4355_v42  ;;  %v4364_v33 = vld [vmem:[%s3438_s30 + $0xe4] sm:$0xf]  ;;  %v4367_v54 = vld [vmem:[%s3438_s30 + $0xe8] sm:$0xf] }
  0xb4   : > { %v1860_v35 = vsel %vm1781_vm3, %v2955_v6, %v1595_v21  ;;  %v4361_v14 = vsel %vm3459_vm2, %v820_v38, %v824_v31  ;;  %v3028_v21 = vcombine.low %v4364_v33, %v4367_v54  ;;  %v4372_v40 = vld [vmem:[%s4274_s6 + $0x8] sm:$0xf]  ;;  %v414_v29 = vld [vmem:[%s4274_s6 + $0xc] sm:$0x1]  ;;  %v2988_v31 = vcombine.low %v4195_v13, %v4278_v36 }
  0xb5   : > { %v1228_v53 = vrot.slane %v1227_v32, 4  ;;  %v1241_v2 = vor.u32 %v1240_v27, %v1237_v18  ;;  %2497 = vmatmul.mubr.bf16.gmra.mrb[4].mxu1 %v1860_v35  ;;  %v1597_v50 = vpop.permute.xlu1 %1596  ;;  %v3060_v1 = vcombine.low %v4361_v14, %v3526_v60  ;;  %v1936_v18 = vsel %vm1781_vm3, %v3010_v57, %v1714_v5 }
  0xb6   : > { %v2938_v6 = vcombine.low %v4176_v45, %v4289_v48  ;;  %1622 = vrot.lane.b32.xlu1 %v3005_v16, %s3374_s13  ;;  %2326 = vmatprep.mubr.bf16.mxu0 %v1936_v18  ;;  %v2008_v27 = vsel %vm1781_vm3, %v3028_v21, %v1750_v17  ;;  %v1248_v60 = vshrl.u32 %v4325_v43, 16  ;;  %v1254_v45 = vshll.u32 %v4372_v40, 16  ;;  %v3314_v18 = vld [vmem:[%s3438_s30 + $0x30] sm:$0xf] }
  0xb7   : > { %v4385_v38 = vsel %vm3459_vm2, %v1228_v53, %v1232_v58  ;;  %v1242_v32 = vrot.slane %v1241_v2, 4  ;;  %v1716_v35 = vpop.permute.xlu0 %1715  ;;  %1741 = vrot.lane.b32.xlu0 %v3060_v1, %s3374_s13  ;;  %2506 = vmatprep.mubr.bf16.mxu1 %v2008_v27  ;;  %v1258_v5 = vshrl.u32 %v4372_v40, 16  ;;  %v1264_v36 = vshll.u32 %v414_v29, 16 }
  0xb8   : > { %v1792_v13 = vsel %vm1781_vm3, %v2938_v6, %v1561_v25  ;;  %v1250_v17 = vrot.slane %v1248_v60, 4  ;;  %v2956_v16 = vcombine.low %v4211_v61, %v4297_v39  ;;  %v3006_v25 = vcombine.low %v4241_v11, %v4322_v56  ;;  %v4405_v6 = vld [vmem:[%s3438_s30 + $0x34] sm:$0xf] }
  0xb9   : > { %v1247_v48 = vsel %vm3459_vm2, %v1242_v32, %v1246_v63  ;;  %2327 = vmatmul.mubr.bf16.gmra.mrb[8].mxu0 %v1792_v13  ;;  %v1256_v57 = vrot.slane %v1254_v45, 5  ;;  %v1260_v53 = vrot.slane %v1258_v5, 4  ;;  %v3061_v2 = vcombine.low %v3532_v0, %v3566_v49  ;;  %v3316_v32 = vld [vmem:[%s3438_s30 + $0xf0] sm:$0xf]  ;;  %v4412_v0 = vld [vmem:[%s3438_s30 + $0xf4] sm:$0xf] }
  0xba   : > { %v3078_v58 = vcombine.low %v4385_v38, %v1247_v48  ;;  %v1251_v21 = vor.u32 %v1250_v17, %v1246_v63  ;;  %v1864_v29 = vsel %vm1781_vm3, %v2956_v16, %v1597_v50  ;;  %v3011_v61 = vcombine.low %v3314_v18, %v4405_v6  ;;  %v3318_v5 = vld [vmem:[%s3438_s30 + $0x38] sm:$0xf] }
  0xbb   : > { %v1752_v1 = vpop.permute.xlu1 %1751  ;;  %v1563_v39 = vpop.permute.xlu0 %1562  ;;  %1588 = vrot.lane.b32.xlu0 %v2988_v31, %s3374_s13  ;;  %v1261_v11 = vor.u32 %v1260_v53, %v1256_v57  ;;  %v1266_v56 = vrot.slane %v1264_v36, 5  ;;  %v3029_v49 = vcombine.low %v3316_v32, %v4412_v0  ;;  %v2939_v63 = vcombine.low %v4292_v12, %v4352_v20  ;;  %v4424_v36 = vld [vmem:[%s3438_s30 + $0x40] sm:$0xf] }
  0xbc   : > { %1777 = vrot.lane.b32.xlu1 %v3078_v58, %s3374_s13  ;;  %v1252_v50 = vrot.slane %v1251_v21, 4  ;;  %v1940_v27 = vsel %vm1781_vm3, %v3011_v61, %v1716_v35  ;;  %v2957_v60 = vcombine.low %v4300_v15, %v4364_v33  ;;  %v3012_v12 = vcombine.low %v3318_v5, %v4424_v36  ;;  %v4439_v53 = vld [vmem:[%s3438_s30 + $0x100] sm:$0xf] }
  0xbd   : > { %2507 = vmatmul.mubr.bf16.gmra.mrb[8].mxu1 %v1864_v29  ;;  %v1262_v13 = vrot.slane %v1261_v11, 4  ;;  %2336 = vmatprep.mubr.bf16.mxu0 %v1940_v27  ;;  %v2012_v31 = vsel %vm1781_vm3, %v3029_v49, %v1752_v1  ;;  %v1796_v45 = vsel %vm1781_vm3, %v2939_v63, %v1563_v39  ;;  %v2989_v33 = vcombine.low %v4286_v41, %v4361_v14  ;;  %v4458_v11 = vld [vmem:[%s3438_s30 + $0x108] sm:$0xf] }
  0xbe   : > { %v1257_v20 = vsel %vm3459_vm2, %v1252_v50, %v1256_v57  ;;  %2516 = vmatprep.mubr.bf16.mxu1 %v2012_v31  ;;  %v3320_v57 = vld [vmem:[%s3438_s30 + $0xf8] sm:$0xf]  ;;  %v2940_v34 = vcombine.low %v4355_v42, %v3314_v18  ;;  %v3007_v41 = vcombine.low %v4331_v23, %v4385_v38  ;;  %v2958_v1 = vcombine.low %v4367_v54, %v3316_v32  ;;  %v3322_v42 = vld [vmem:[%s3438_s30 + $0x44] sm:$0xf]  ;;  %v4452_v18 = vld [vmem:[%s3438_s30 + $0x48] sm:$0xf] }
  0xbf   : > { %v1599_v35 = vpop.permute.xlu1 %1598  ;;  %1743 = vrot.lane.b32.xlu0 %v3061_v2, %s3374_s13  ;;  %v1267_v15 = vsel %vm3459_vm2, %v1262_v13, %v1266_v56  ;;  %v3013_v61 = vcombine.low %v3322_v42, %v4452_v18  ;;  %v3324_v38 = vld [vmem:[%s3438_s30 + $0x104] sm:$0xf]  ;;  %v2941_v32 = vcombine.low %v4405_v6, %v3318_v5  ;;  %v3039_v63 = vcombine.low %v4065_v7, %v4107_v24 }
  0xc0   : > { %1624 = vrot.lane.b32.xlu1 %v3006_v25, %s3374_s13  ;;  %v3079_v48 = vcombine.low %v1257_v20, %v1267_v15  ;;  %v1868_v16 = vsel %vm1781_vm3, %v2957_v60, %v1599_v35  ;;  %v3030_v25 = vcombine.low %v3320_v57, %v4439_v53  ;;  %v3031_v56 = vcombine.low %v3324_v38, %v4458_v11 }
  0xc1   : > { %2337 = vmatmul.mubr.bf16.gmra.mrb[12].mxu0 %v1796_v45  ;;  %v1718_v17 = vpop.permute.xlu0 %1717  ;;  %v3022_v50 = vcombine.low %v4094_v9, %v4133_v19  ;;  %v3040_v27 = vcombine.low %v4120_v4, %v4154_v59  ;;  %v3023_v60 = vcombine.low %v4190_v51, %v4199_v22  ;;  %v3041_v13 = vcombine.low %v4225_v46, %v4233_v3 }
  0xc2   : > { %v1944_v58 = vsel %vm1781_vm3, %v3012_v12, %v1718_v17  ;;  %v2951_v6 = vcombine.low %v4081_v26, %v4094_v9  ;;  %v2959_v5 = vcombine.low %v4412_v0, %v3320_v57  ;;  %v2969_v12 = vcombine.low %v4107_v24, %v4120_v4  ;;  %v3327_v17 = vld [vmem:[%s3438_s30 + $0x54] sm:$0xf]  ;;  %v4963_v24 = vld [vmem:[#allocation6_spill] sm:$0xff] }
  0xc3   : > { %2346 = vmatprep.mubr.bf16.mxu0 %v1944_v58  ;;  %1590 = vrot.lane.b32.xlu0 %v2989_v33, %s3374_s13  ;;  %v3042_v20 = vcombine.low %v4245_v30, %v4313_v37  ;;  %v2952_v35 = vcombine.low %v4133_v19, %v4190_v51  ;;  %v2970_v0 = vcombine.low %v4154_v59, %v4225_v46 }
  0xc4   : > { %1779 = vrot.lane.b32.xlu1 %v3079_v48, %s3374_s13  ;;  %v3326_v48 = vld [vmem:[%s3438_s30 + $0x50] sm:$0xf]  ;;  %v3043_v58 = vcombine.low %v4325_v43, %v4372_v40  ;;  %v2953_v57 = vcombine.low %v4199_v22, %v4216_v44  ;;  %v3025_v4 = vcombine.low %v4963_v24, %v4343_v28  ;;  %v2102_v43 = vld [vmem:[%s4942_s3] sm:$0x3] }
  0xc5   : > { %2517 = vmatmul.mubr.bf16.gmra.mrb[12].mxu1 %v1868_v16  ;;  %v1754_v14 = vpop.permute.xlu1 %1753  ;;  %v1565_v2 = vpop.permute.xlu0 %1564  ;;  %v3014_v16 = vcombine.low %v3326_v48, %v3327_v17 }
  0xc6   : > { %v2016_v21 = vsel %vm1781_vm3, %v3030_v25, %v1754_v14  ;;  %v1800_v29 = vsel %vm1781_vm3, %v2940_v34, %v1565_v2  ;;  %v2971_v25 = vcombine.low %v4233_v3, %v4245_v30 }
  0xc7   : > { %2526 = vmatprep.mubr.bf16.mxu1 %v2016_v21  ;;  %v3328_v21 = vld [vmem:[%s3438_s30 + $0x110] sm:$0xf] }
  0xc8   : > { %1626 = vrot.lane.b32.xlu1 %v3007_v41, %s3374_s13 }
  0xc9   : > { %v1601_v39 = vpop.permute.xlu1 %1600  ;;  %2347 = vmatmul.mubr.bf16.gmra.mrb[16].mxu0 %v1800_v29  ;;  %v1720_v23 = vpop.permute.xlu0 %1719  ;;  %v3329_v29 = vld [vmem:[%s3438_s30 + $0x114] sm:$0xf] }
  0xca   : > { %v1872_v49 = vsel %vm1781_vm3, %v2958_v1, %v1601_v39  ;;  %v1948_v54 = vsel %vm1781_vm3, %v3013_v61, %v1720_v23  ;;  %v3032_v1 = vcombine.low %v3328_v21, %v3329_v29  ;;  %v2942_v61 = vcombine.low %v4424_v36, %v3322_v42 }
  0xcb   : > { %2356 = vmatprep.mubr.bf16.mxu0 %v1948_v54  ;;  %v2960_v54 = vcombine.low %v4439_v53, %v3324_v38 }
  0xcd   : > { %2527 = vmatmul.mubr.bf16.gmra.mrb[16].mxu1 %v1872_v49  ;;  %v1756_v31 = vpop.permute.xlu1 %1755  ;;  %v1567_v45 = vpop.permute.xlu0 %1566 }
  0xce   : > { %v2020_v15 = vsel %vm1781_vm3, %v3031_v56, %v1756_v31  ;;  %v1804_v33 = vsel %vm1781_vm3, %v2941_v32, %v1567_v45  ;;  %v3330_v32 = vld [vmem:[%s3438_s30 + $0x58] sm:$0xf]  ;;  %v3331_v31 = vld [vmem:[%s3438_s30 + $0x60] sm:$0xf] }
  0xcf   : > { %2536 = vmatprep.mubr.bf16.mxu1 %v2020_v15  ;;  %v3015_v45 = vcombine.low %v3330_v32, %v3331_v31 }
  0xd1   : > { %v1603_v34 = vpop.permute.xlu1 %1602  ;;  %2357 = vmatmul.mubr.bf16.gmra.mrb[20].mxu0 %v1804_v33  ;;  %v1722_v41 = vpop.permute.xlu0 %1721  ;;  %v2943_v33 = vcombine.low %v4452_v18, %v3326_v48 }
  0xd2   : > { %v1876_v14 = vsel %vm1781_vm3, %v2959_v5, %v1603_v34  ;;  %v1952_v2 = vsel %vm1781_vm3, %v3014_v16, %v1722_v41  ;;  %v3332_v16 = vld [vmem:[%s3438_s30 + $0x118] sm:$0xf]  ;;  %v3333_v34 = vld [vmem:[%s3438_s30 + $0x120] sm:$0xf] }
  0xd3   : > { %2366 = vmatprep.mubr.bf16.mxu0 %v1952_v2  ;;  %v3033_v41 = vcombine.low %v3332_v16, %v3333_v34  ;;  %v3334_v2 = vld [vmem:[%s3438_s30 + $0x64] sm:$0xf] }
  0xd5   : > { %2537 = vmatmul.mubr.bf16.gmra.mrb[20].mxu1 %v1876_v14  ;;  %v1758_v39 = vpop.permute.xlu1 %1757  ;;  %v1569_v23 = vpop.permute.xlu0 %1568 }
  0xd6   : > { %v2024_v56 = vsel %vm1781_vm3, %v3032_v1, %v1758_v39  ;;  %v1808_v49 = vsel %vm1781_vm3, %v2942_v61, %v1569_v23  ;;  %v3335_v1 = vld [vmem:[%s3438_s30 + $0x68] sm:$0xf]  ;;  %v2961_v23 = vcombine.low %v4458_v11, %v3328_v21 }
  0xd7   : > { %2546 = vmatprep.mubr.bf16.mxu1 %v2024_v56  ;;  %v3016_v61 = vcombine.low %v3334_v2, %v3335_v1 }
  0xd9   : > { %v1605_v5 = vpop.permute.xlu1 %1604  ;;  %2367 = vmatmul.mubr.bf16.gmra.mrb[24].mxu0 %v1808_v49  ;;  %v2944_v49 = vcombine.low %v3327_v17, %v3330_v32 }
  0xda   : > { %v1880_v36 = vsel %vm1781_vm3, %v2960_v54, %v1605_v5  ;;  %v1724_v42 = vpop.permute.xlu0 %1723  ;;  %v3337_v5 = vld [vmem:[%s3438_s30 + $0x128] sm:$0xf] }
  0xdb   : > { %v1956_v15 = vsel %vm1781_vm3, %v3015_v45, %v1724_v42  ;;  %v3336_v45 = vld [vmem:[%s3438_s30 + $0x124] sm:$0xf] }
  0xdc   : > { %2376 = vmatprep.mubr.bf16.mxu0 %v1956_v15 }
  0xdd   : > { %2547 = vmatmul.mubr.bf16.gmra.mrb[24].mxu1 %v1880_v36  ;;  %v3034_v36 = vcombine.low %v3336_v45, %v3337_v5 }
  0xde   : > { %v1571_v53 = vpop.permute.xlu0 %1570 }
  0xdf   : > { %v1760_v38 = vpop.permute.xlu1 %1759  ;;  %v1812_v14 = vsel %vm1781_vm3, %v2943_v33, %v1571_v53  ;;  %v2962_v33 = vcombine.low %v3329_v29, %v3332_v16  ;;  %v3339_v53 = vld [vmem:[%s3438_s30 + $0x74] sm:$0xf] }
  0xe0   : > { %v2028_v39 = vsel %vm1781_vm3, %v3033_v41, %v1760_v38  ;;  %v3338_v41 = vld [vmem:[%s3438_s30 + $0x70] sm:$0xf] }
  0xe1   : > { %2556 = vmatprep.mubr.bf16.mxu1 %v2028_v39  ;;  %2377 = vmatmul.mubr.bf16.gmra.mrb[28].mxu0 %v1812_v14  ;;  %v3017_v38 = vcombine.low %v3338_v41, %v3339_v53  ;;  %v2945_v39 = vcombine.low %v3331_v31, %v3334_v2 }
  0xe2   : > { %v1726_v18 = vpop.permute.xlu0 %1725 }
  0xe3   : > { %v1607_v48 = vpop.permute.xlu1 %1606  ;;  %v1960_v56 = vsel %vm1781_vm3, %v3016_v61, %v1726_v18  ;;  %v3341_v18 = vld [vmem:[%s3438_s30 + $0x134] sm:$0xf] }
  0xe4   : > { %v1884_v54 = vsel %vm1781_vm3, %v2961_v23, %v1607_v48  ;;  %2386 = vmatprep.mubr.bf16.mxu0 %v1960_v56  ;;  %v3340_v23 = vld [vmem:[%s3438_s30 + $0x130] sm:$0xf] }
  0xe5   : > { %2557 = vmatmul.mubr.bf16.gmra.mrb[28].mxu1 %v1884_v54  ;;  %v3035_v29 = vcombine.low %v3340_v23, %v3341_v18  ;;  %v2963_v54 = vcombine.low %v3333_v34, %v3336_v45 }
  0xe6   : > { %v1573_v42 = vpop.permute.xlu0 %1572 }
  0xe7   : > { %v1762_v15 = vpop.permute.xlu1 %1761  ;;  %v1816_v11 = vsel %vm1781_vm3, %v2944_v49, %v1573_v42  ;;  %v3343_v42 = vld [vmem:[%s3438_s30 + $0x80] sm:$0xf] }
  0xe8   : > { %v2032_v21 = vsel %vm1781_vm3, %v3034_v36, %v1762_v15  ;;  %v3342_v36 = vld [vmem:[%s3438_s30 + $0x78] sm:$0xf] }
  0xe9   : > { %2566 = vmatprep.mubr.bf16.mxu1 %v2032_v21  ;;  %2387 = vmatmul.mubr.bf16.gmra.mrb[32].mxu0 %v1816_v11  ;;  %v3018_v15 = vcombine.low %v3342_v36, %v3343_v42 }
  0xeb   : > { %v1609_v17 = vpop.permute.xlu1 %1608  ;;  %v1728_v32 = vpop.permute.xlu0 %1727 }
  0xec   : > { %v1888_v14 = vsel %vm1781_vm3, %v2962_v33, %v1609_v17  ;;  %v1964_v61 = vsel %vm1781_vm3, %v3017_v38, %v1728_v32  ;;  %v3344_v33 = vld [vmem:[%s3438_s30 + $0x138] sm:$0xf]  ;;  %v2946_v17 = vcombine.low %v3335_v1, %v3338_v41  ;;  %v2947_v41 = vcombine.low %v3339_v53, %v3342_v36  ;;  %v4959_v36 = vld [vmem:[#allocation4_spill] sm:$0xff] }
  0xed   : > { %2567 = vmatmul.mubr.bf16.gmra.mrb[32].mxu1 %v1888_v14  ;;  %2396 = vmatprep.mubr.bf16.mxu0 %v1964_v61  ;;  %v3036_v38 = vcombine.low %v3344_v33, %v3956_v8  ;;  %v2964_v61 = vcombine.low %v3337_v5, %v3340_v23  ;;  %v3037_v8 = vcombine.low %v3968_v52, %v3999_v47 }
  0xef   : > { %v1575_v16 = vpop.permute.xlu0 %1574 }
  0xf0   : > { %v1764_v48 = vpop.permute.xlu1 %1763  ;;  %v1820_v56 = vsel %vm1781_vm3, %v2945_v39, %v1575_v16  ;;  %v3345_v39 = vld [vmem:[%s3438_s30 + $0x84] sm:$0xf] }
  0xf1   : > { %v2036_v49 = vsel %vm1781_vm3, %v3035_v29, %v1764_v48  ;;  %2397 = vmatmul.mubr.bf16.gmra.mrb[36].mxu0 %v1820_v56  ;;  %v3019_v29 = vcombine.low %v3345_v39, %v3979_v10 }
  0xf2   : > { %2576 = vmatprep.mubr.bf16.mxu1 %v2036_v49 }
  0xf4   : > { %v1611_v11 = vpop.permute.xlu1 %1610  ;;  %v1730_v31 = vpop.permute.xlu0 %1729 }
  0xf5   : > { %v1892_v2 = vsel %vm1781_vm3, %v2963_v54, %v1611_v11  ;;  %v1968_v21 = vsel %vm1781_vm3, %v3018_v15, %v1730_v31  ;;  %v2965_v54 = vcombine.low %v3341_v18, %v3344_v33  ;;  %v3020_v15 = vcombine.low %v4024_v62, %v4027_v55  ;;  %v4960_v31 = vld [vmem:[#allocation3_spill] sm:$0xff] }
  0xf6   : > { %2577 = vmatmul.mubr.bf16.gmra.mrb[36].mxu1 %v1892_v2  ;;  %2406 = vmatprep.mubr.bf16.mxu0 %v1968_v21  ;;  %v3038_v2 = vcombine.low %v4960_v31, %v4959_v36  ;;  %v2948_v18 = vcombine.low %v3343_v42, %v3345_v39 }
  0xf8   : > { %v1766_v32 = vpop.permute.xlu1 %1765  ;;  %v1577_v14 = vpop.permute.xlu0 %1576 }
  0xf9   : > { %v2040_v34 = vsel %vm1781_vm3, %v3036_v38, %v1766_v32  ;;  %v1824_v45 = vsel %vm1781_vm3, %v2946_v17, %v1577_v14  ;;  %v3346_v32 = vld [vmem:[%s3438_s30 + $0x140] sm:$0xf]  ;;  %v3347_v14 = vld [vmem:[%s3438_s30 + $0x144] sm:$0xf] }
  0xfa   : > { %2586 = vmatprep.mubr.bf16.mxu1 %v2040_v34  ;;  %2407 = vmatmul.mubr.bf16.gmra.mrb[40].mxu0 %v1824_v45  ;;  %v2966_v34 = vcombine.low %v3346_v32, %v3347_v14  ;;  %v4961_v45 = vld [vmem:[#allocation2_spill] sm:$0xff] }
  0xfc   : > { %v1613_v16 = vpop.permute.xlu1 %1612 }
  0xfd   : > { %v1896_v48 = vsel %vm1781_vm3, %v2964_v61, %v1613_v16  ;;  %v1732_v56 = vpop.permute.xlu0 %1731  ;;  %v3021_v61 = vcombine.low %v4961_v45, %v4081_v26 }
  0xfe   : > { %2587 = vmatmul.mubr.bf16.gmra.mrb[40].mxu1 %v1896_v48  ;;  %v1972_v1 = vsel %vm1781_vm3, %v3019_v29, %v1732_v56  ;;  %v3348_v48 = vld [vmem:[%s3438_s30 + $0x88] sm:$0xf] }
  0xff   : > { %2416 = vmatprep.mubr.bf16.mxu0 %v1972_v1  ;;  %v2949_v56 = vcombine.low %v3348_v48, %v4024_v62 }
 0x100   : > { %v1768_v49 = vpop.permute.xlu1 %1767 }
 0x101   : > { %v2044_v5 = vsel %vm1781_vm3, %v3037_v8, %v1768_v49  ;;  %v1579_v23 = vpop.permute.xlu0 %1578 }
 0x102   : > { %2596 = vmatprep.mubr.bf16.mxu1 %v2044_v5  ;;  %v1828_v10 = vsel %vm1781_vm3, %v2947_v41, %v1579_v23  ;;  %v3349_v5 = vld [vmem:[%s3438_s30 + $0x148] sm:$0xf] }
 0x103   : > { %2417 = vmatmul.mubr.bf16.gmra.mrb[44].mxu0 %v1828_v10  ;;  %v2967_v23 = vcombine.low %v3349_v5, %v4960_v31 }
 0x104   : > { %v1615_v52 = vpop.permute.xlu1 %1614 }
 0x105   : > { %v1900_v47 = vsel %vm1781_vm3, %v2965_v54, %v1615_v52  ;;  %v1734_v11 = vpop.permute.xlu0 %1733 }
 0x106   : > { %2597 = vmatmul.mubr.bf16.gmra.mrb[44].mxu1 %v1900_v47  ;;  %v1976_v53 = vsel %vm1781_vm3, %v3020_v15, %v1734_v11  ;;  %v2950_v15 = vcombine.low %v4027_v55, %v4961_v45 }
 0x107   : > { %2426 = vmatprep.mubr.bf16.mxu0 %v1976_v53 }
 0x109   : > { %v1770_v21 = vpop.permute.xlu1 %1769  ;;  %v1581_v33 = vpop.permute.xlu0 %1580 }
 0x10a   : > { %v2048_v38 = vsel %vm1781_vm3, %v3038_v2, %v1770_v21  ;;  %v1832_v17 = vsel %vm1781_vm3, %v2948_v18, %v1581_v33 }
 0x10b   : > { %2606 = vmatprep.mubr.bf16.mxu1 %v2048_v38  ;;  %2427 = vmatmul.mubr.bf16.gmra.mrb[48].mxu0 %v1832_v17 }
 0x10d   : > { %v1617_v29 = vpop.permute.xlu1 %1616 }
 0x10e   : > { %v1904_v42 = vsel %vm1781_vm3, %v2966_v34, %v1617_v29  ;;  %v1736_v39 = vpop.permute.xlu0 %1735 }
 0x10f   : > { %2607 = vmatmul.mubr.bf16.gmra.mrb[48].mxu1 %v1904_v42  ;;  %v1980_v16 = vsel %vm1781_vm3, %v3021_v61, %v1736_v39 }
 0x110   : > { %2436 = vmatprep.mubr.bf16.mxu0 %v1980_v16 }
 0x112   : > { %v1583_v8 = vpop.permute.xlu0 %1582 }
 0x113   : > { %v1772_v1 = vpop.permute.xlu1 %1771  ;;  %v1836_v41 = vsel %vm1781_vm3, %v2949_v56, %v1583_v8 }
 0x114   : > { %v2052_v49 = vsel %vm1781_vm3, %v3039_v63, %v1772_v1  ;;  %2437 = vmatmul.mubr.bf16.gmra.mrb[52].mxu0 %v1836_v41 }
 0x115   : > { %2616 = vmatprep.mubr.bf16.mxu1 %v2052_v49 }
 0x116   : > { %v1738_v54 = vpop.permute.xlu0 %1737 }
 0x117   : > { %v1619_v10 = vpop.permute.xlu1 %1618  ;;  %v1984_v62 = vsel %vm1781_vm3, %v3022_v50, %v1738_v54  ;;  %v2968_v50 = vcombine.low %v4959_v36, %v4065_v7  ;;  %v4962_v36 = vld [vmem:[#allocation5_spill] sm:$0xff] }
 0x118   : > { %v1908_v52 = vsel %vm1781_vm3, %v2967_v23, %v1619_v10  ;;  %2446 = vmatprep.mubr.bf16.mxu0 %v1984_v62  ;;  %v3024_v38 = vcombine.low %v4216_v44, %v4962_v36 }
 0x119   : > { %2617 = vmatmul.mubr.bf16.gmra.mrb[52].mxu1 %v1908_v52 }
 0x11a   : > { %v1585_v63 = vpop.permute.xlu0 %1584 }
 0x11b   : > { %v1774_v47 = vpop.permute.xlu1 %1773  ;;  %v1840_v11 = vsel %vm1781_vm3, %v2950_v15, %v1585_v63 }
 0x11c   : > { %v2056_v53 = vsel %vm1781_vm3, %v3040_v27, %v1774_v47  ;;  %2447 = vmatmul.mubr.bf16.gmra.mrb[56].mxu0 %v1840_v11 }
 0x11d   : > { %2626 = vmatprep.mubr.bf16.mxu1 %v2056_v53 }
 0x11f   : > { %v1621_v31 = vpop.permute.xlu1 %1620 }
 0x120   : > { %v1912_v55 = vsel %vm1781_vm3, %v2968_v50, %v1621_v31 }
 0x121   : > { %2627 = vmatmul.mubr.bf16.gmra.mrb[56].mxu1 %v1912_v55  ;;  %v1740_v2 = vpop.permute.xlu0 %1739 }
 0x122   : > { %v1988_v18 = vsel %vm1781_vm3, %v3023_v60, %v1740_v2 }
 0x123   : > { %2456 = vmatprep.mubr.bf16.mxu0 %v1988_v18 }
 0x124   : > { %v1776_v21 = vpop.permute.xlu1 %1775 }
 0x125   : > { %v1587_v33 = vpop.permute.xlu0 %1586  ;;  %v2060_v27 = vsel %vm1781_vm3, %v3041_v13, %v1776_v21 }
 0x126   : > { %v1844_v7 = vsel %vm1781_vm3, %v2951_v6, %v1587_v33  ;;  %2636 = vmatprep.mubr.bf16.mxu1 %v2060_v27 }
 0x127   : > { %2457 = vmatmul.mubr.bf16.gmra.mrb[60].mxu0 %v1844_v7 }
 0x128   : > { %v1623_v17 = vpop.permute.xlu1 %1622 }
 0x129   : > { %v1916_v60 = vsel %vm1781_vm3, %v2969_v12, %v1623_v17  ;;  %v1742_v32 = vpop.permute.xlu0 %1741 }
 0x12a   : > { %2637 = vmatmul.mubr.bf16.gmra.mrb[60].mxu1 %v1916_v60  ;;  %v1992_v13 = vsel %vm1781_vm3, %v3024_v38, %v1742_v32 }
 0x12b   : > { %2466 = vmatprep.mubr.bf16.mxu0 %v1992_v13 }
 0x12d   : > { %v1589_v26 = vpop.permute.xlu0 %1588 }
 0x12e   : > { %v1778_v14 = vpop.permute.xlu1 %1777  ;;  %v1848_v6 = vsel %vm1781_vm3, %v2952_v35, %v1589_v26  ;;  %v2104_v35 = vlaneseq }
 0x12f   : > { %v2064_v9 = vsel %vm1781_vm3, %v3042_v20, %v1778_v14  ;;  %2467 = vmatmul.mubr.bf16.gmra.mrb[64].mxu0 %v1848_v6 }
 0x130   : > { %2646 = vmatprep.mubr.bf16.mxu1 %v2064_v9 }
 0x131   : > { %v1744_v34 = vpop.permute.xlu0 %1743 }
 0x132   : > { %v1625_v12 = vpop.permute.xlu1 %1624  ;;  %v1996_v37 = vsel %vm1781_vm3, %v3025_v4, %v1744_v34 }
 0x133   : > { %v1920_v45 = vsel %vm1781_vm3, %v2970_v0, %v1625_v12  ;;  %2476 = vmatprep.mubr.bf16.mxu0 %v1996_v37  ;;  %v2105_v0 = vshrl.u32 %v2104_v35, 7 }
 0x134   : > { %2647 = vmatmul.mubr.bf16.gmra.mrb[64].mxu1 %v1920_v45 }
 0x135   : > { %v1591_v51 = vpop.permute.xlu0 %1590  ;;  %v2106_v61 = vsub.s32 0, %v2105_v0  ;;  %v2110_v40 = vsub.s32 1, %v2105_v0 }
 0x136   : > { %v1780_v19 = vpop.permute.xlu1 %1779  ;;  %v1852_v20 = vsel %vm1781_vm3, %v2953_v57, %v1591_v51 }
 0x137   : > { %v2068_v28 = vsel %vm1781_vm3, %v3043_v58, %v1780_v19  ;;  %2477 = vmatmul.mubr.bf16.gmra.mrb[68].mxu0 %v1852_v20  ;;  %v4633_v22 = vrot.slane %v2102_v43, %v2106_v61  ;;  %v4635_v44 = vrot.slane %v2102_v43, %v2110_v40 }
 0x138   : > { %2656 = vmatprep.mubr.bf16.mxu1 %v2068_v28 }
 0x13a   : > { %v1627_v59 = vpop.permute.xlu1 %1626 }
 0x13b   : > { %v1924_v46 = vsel %vm1781_vm3, %v2971_v25, %v1627_v59 }
 0x13c   : > { %2657 = vmatmul.mubr.bf16.gmra.mrb[68].mxu1 %v1924_v46 }
 0x178   : > { %v2308_v3 = vpop.f32.mrb[0].mxu0 }
 0x179   : > { %v2309_v30 = vadd.f32 %v2308_v3, %v4633_v22  ;;  %v2310_v58 = vpop.f32.mrb[1].mxu0 }
 0x17a   : > { %v2311_v57 = vadd.f32 %v2310_v58, %v4635_v44  ;;  %v2312_v25 = vpop.f32.mrb[2].mxu0 }
 0x17b   : > { %2667 = vst [vmem:[%s4640_s10] sm:$0xff] %v2309_v30  ;;  %v2313_v29 = vadd.f32 %v2312_v25, %v4633_v22  ;;  %v2314_v42 = vpop.f32.mrb[3].mxu0 }
 0x17c   : > { %2668 = vst [vmem:[%s4640_s10 + $0x8] sm:$0xff] %v2311_v57  ;;  %v2315_v39 = vadd.f32 %v2314_v42, %v4635_v44 }
 0x17d   : > { %2669 = vst [vmem:[%s4640_s10 + $0x10] sm:$0xff] %v2313_v29 }
 0x17e   : > { %2670 = vst [vmem:[%s4640_s10 + $0x18] sm:$0xff] %v2315_v39 }
 0x17f   : > { %v2488_v16 = vpop.f32.mrb[0].mxu1 }
 0x180   : > { %v2489_v48 = vadd.f32 %v2488_v16, %v4633_v22  ;;  %v2490_v56 = vpop.f32.mrb[1].mxu1 }
 0x181   : > { %v2491_v8 = vadd.f32 %v2490_v56, %v4635_v44  ;;  %v2492_v1 = vpop.f32.mrb[2].mxu1 }
 0x182   : > { %2739 = vst [vmem:[%s4640_s10 + $0x240] sm:$0xff] %v2489_v48  ;;  %v2493_v41 = vadd.f32 %v2492_v1, %v4633_v22  ;;  %v2494_v49 = vpop.f32.mrb[3].mxu1 }
 0x183   : > { %2740 = vst [vmem:[%s4640_s10 + $0x248] sm:$0xff] %v2491_v8  ;;  %v2495_v5 = vadd.f32 %v2494_v49, %v4635_v44 }
 0x184   : > { %2741 = vst [vmem:[%s4640_s10 + $0x250] sm:$0xff] %v2493_v41  ;;  %v2318_v23 = vpop.f32.mrb[4].mxu0 }
 0x185   : > { %2742 = vst [vmem:[%s4640_s10 + $0x258] sm:$0xff] %v2495_v5  ;;  %v2319_v54 = vadd.f32 %v2318_v23, %v4633_v22  ;;  %v2320_v10 = vpop.f32.mrb[5].mxu0 }
 0x186   : > { %v2321_v62 = vadd.f32 %v2320_v10, %v4635_v44  ;;  %v2322_v15 = vpop.f32.mrb[6].mxu0 }
 0x187   : > { %2671 = vst [vmem:[%s4640_s10 + $0x20] sm:$0xff] %v2319_v54  ;;  %v2323_v52 = vadd.f32 %v2322_v15, %v4633_v22  ;;  %v2324_v63 = vpop.f32.mrb[7].mxu0 }
 0x188   : > { %2672 = vst [vmem:[%s4640_s10 + $0x28] sm:$0xff] %v2321_v62  ;;  %v2498_v47 = vpop.f32.mrb[4].mxu1  ;;  %v2325_v11 = vadd.f32 %v2324_v63, %v4635_v44 }
 0x189   : > { %v2499_v53 = vadd.f32 %v2498_v47, %v4633_v22  ;;  %2673 = vst [vmem:[%s4640_s10 + $0x30] sm:$0xff] %v2323_v52  ;;  %v2500_v50 = vpop.f32.mrb[5].mxu1 }
 0x18a   : > { %v2501_v31 = vadd.f32 %v2500_v50, %v4635_v44  ;;  %2674 = vst [vmem:[%s4640_s10 + $0x38] sm:$0xff] %v2325_v11  ;;  %v2502_v55 = vpop.f32.mrb[6].mxu1 }
 0x18b   : > { %2743 = vst [vmem:[%s4640_s10 + $0x260] sm:$0xff] %v2499_v53  ;;  %v2503_v2 = vadd.f32 %v2502_v55, %v4633_v22  ;;  %v2504_v18 = vpop.f32.mrb[7].mxu1 }
 0x18c   : > { %2744 = vst [vmem:[%s4640_s10 + $0x268] sm:$0xff] %v2501_v31  ;;  %v2505_v21 = vadd.f32 %v2504_v18, %v4635_v44  ;;  %v2328_v33 = vpop.f32.mrb[8].mxu0 }
 0x18d   : > { %2745 = vst [vmem:[%s4640_s10 + $0x270] sm:$0xff] %v2503_v2  ;;  %v2329_v27 = vadd.f32 %v2328_v33, %v4633_v22  ;;  %v2330_v7 = vpop.f32.mrb[9].mxu0 }
 0x18e   : > { %2746 = vst [vmem:[%s4640_s10 + $0x278] sm:$0xff] %v2505_v21  ;;  %v2331_v36 = vadd.f32 %v2330_v7, %v4635_v44  ;;  %v2332_v38 = vpop.f32.mrb[10].mxu0 }
 0x18f   : > { %2675 = vst [vmem:[%s4640_s10 + $0x40] sm:$0xff] %v2329_v27  ;;  %v2333_v17 = vadd.f32 %v2332_v38, %v4633_v22  ;;  %v2334_v60 = vpop.f32.mrb[11].mxu0 }
 0x190   : > { %2676 = vst [vmem:[%s4640_s10 + $0x48] sm:$0xff] %v2331_v36  ;;  %v2508_v32 = vpop.f32.mrb[8].mxu1  ;;  %v2335_v13 = vadd.f32 %v2334_v60, %v4635_v44 }
 0x191   : > { %v2509_v14 = vadd.f32 %v2508_v32, %v4633_v22  ;;  %2677 = vst [vmem:[%s4640_s10 + $0x50] sm:$0xff] %v2333_v17  ;;  %v2510_v26 = vpop.f32.mrb[9].mxu1 }
 0x192   : > { %v2511_v9 = vadd.f32 %v2510_v26, %v4635_v44  ;;  %2678 = vst [vmem:[%s4640_s10 + $0x58] sm:$0xff] %v2335_v13  ;;  %v2512_v6 = vpop.f32.mrb[10].mxu1 }
 0x193   : > { %2747 = vst [vmem:[%s4640_s10 + $0x280] sm:$0xff] %v2509_v14  ;;  %v2513_v24 = vadd.f32 %v2512_v6, %v4633_v22  ;;  %v2514_v4 = vpop.f32.mrb[11].mxu1 }
 0x194   : > { %2748 = vst [vmem:[%s4640_s10 + $0x288] sm:$0xff] %v2511_v9  ;;  %v2515_v12 = vadd.f32 %v2514_v4, %v4635_v44  ;;  %v2338_v34 = vpop.f32.mrb[12].mxu0 }
 0x195   : > { %2749 = vst [vmem:[%s4640_s10 + $0x290] sm:$0xff] %v2513_v24  ;;  %v2339_v45 = vadd.f32 %v2338_v34, %v4633_v22  ;;  %v2340_v37 = vpop.f32.mrb[13].mxu0 }
 0x196   : > { %2750 = vst [vmem:[%s4640_s10 + $0x298] sm:$0xff] %v2515_v12  ;;  %v2341_v19 = vadd.f32 %v2340_v37, %v4635_v44  ;;  %v2342_v51 = vpop.f32.mrb[14].mxu0 }
 0x197   : > { %2679 = vst [vmem:[%s4640_s10 + $0x60] sm:$0xff] %v2339_v45  ;;  %v2343_v28 = vadd.f32 %v2342_v51, %v4633_v22  ;;  %v2344_v20 = vpop.f32.mrb[15].mxu0 }
 0x198   : > { %2680 = vst [vmem:[%s4640_s10 + $0x68] sm:$0xff] %v2341_v19  ;;  %v2518_v59 = vpop.f32.mrb[12].mxu1  ;;  %v2345_v46 = vadd.f32 %v2344_v20, %v4635_v44 }
 0x199   : > { %v2519_v35 = vadd.f32 %v2518_v59, %v4633_v22  ;;  %2681 = vst [vmem:[%s4640_s10 + $0x70] sm:$0xff] %v2343_v28  ;;  %v2520_v0 = vpop.f32.mrb[13].mxu1 }
 0x19a   : > { %v2521_v61 = vadd.f32 %v2520_v0, %v4635_v44  ;;  %2682 = vst [vmem:[%s4640_s10 + $0x78] sm:$0xff] %v2345_v46  ;;  %v2522_v43 = vpop.f32.mrb[14].mxu1 }
 0x19b   : > { %2751 = vst [vmem:[%s4640_s10 + $0x2a0] sm:$0xff] %v2519_v35  ;;  %v2523_v40 = vadd.f32 %v2522_v43, %v4633_v22  ;;  %v2524_v3 = vpop.f32.mrb[15].mxu1 }
 0x19c   : > { %2752 = vst [vmem:[%s4640_s10 + $0x2a8] sm:$0xff] %v2521_v61  ;;  %v2525_v30 = vadd.f32 %v2524_v3, %v4635_v44  ;;  %v2348_v58 = vpop.f32.mrb[16].mxu0 }
 0x19d   : > { %2753 = vst [vmem:[%s4640_s10 + $0x2b0] sm:$0xff] %v2523_v40  ;;  %v2349_v57 = vadd.f32 %v2348_v58, %v4633_v22  ;;  %v2350_v25 = vpop.f32.mrb[17].mxu0 }
 0x19e   : > { %2754 = vst [vmem:[%s4640_s10 + $0x2b8] sm:$0xff] %v2525_v30  ;;  %v2351_v29 = vadd.f32 %v2350_v25, %v4635_v44  ;;  %v2352_v42 = vpop.f32.mrb[18].mxu0 }
 0x19f   : > { %2683 = vst [vmem:[%s4640_s10 + $0x80] sm:$0xff] %v2349_v57  ;;  %v2353_v39 = vadd.f32 %v2352_v42, %v4633_v22  ;;  %v2354_v16 = vpop.f32.mrb[19].mxu0 }
 0x1a0   : > { %2684 = vst [vmem:[%s4640_s10 + $0x88] sm:$0xff] %v2351_v29  ;;  %v2528_v48 = vpop.f32.mrb[16].mxu1  ;;  %v2355_v56 = vadd.f32 %v2354_v16, %v4635_v44 }
 0x1a1   : > { %v2529_v8 = vadd.f32 %v2528_v48, %v4633_v22  ;;  %2685 = vst [vmem:[%s4640_s10 + $0x90] sm:$0xff] %v2353_v39  ;;  %v2530_v1 = vpop.f32.mrb[17].mxu1 }
 0x1a2   : > { %v2531_v41 = vadd.f32 %v2530_v1, %v4635_v44  ;;  %2686 = vst [vmem:[%s4640_s10 + $0x98] sm:$0xff] %v2355_v56  ;;  %v2532_v49 = vpop.f32.mrb[18].mxu1 }
 0x1a3   : > { %2755 = vst [vmem:[%s4640_s10 + $0x2c0] sm:$0xff] %v2529_v8  ;;  %v2533_v5 = vadd.f32 %v2532_v49, %v4633_v22  ;;  %v2534_v23 = vpop.f32.mrb[19].mxu1 }
 0x1a4   : > { %2756 = vst [vmem:[%s4640_s10 + $0x2c8] sm:$0xff] %v2531_v41  ;;  %v2535_v54 = vadd.f32 %v2534_v23, %v4635_v44  ;;  %v2358_v10 = vpop.f32.mrb[20].mxu0 }
 0x1a5   : > { %2757 = vst [vmem:[%s4640_s10 + $0x2d0] sm:$0xff] %v2533_v5  ;;  %v2359_v62 = vadd.f32 %v2358_v10, %v4633_v22  ;;  %v2360_v15 = vpop.f32.mrb[21].mxu0 }
 0x1a6   : > { %2758 = vst [vmem:[%s4640_s10 + $0x2d8] sm:$0xff] %v2535_v54  ;;  %v2361_v52 = vadd.f32 %v2360_v15, %v4635_v44  ;;  %v2362_v63 = vpop.f32.mrb[22].mxu0 }
 0x1a7   : > { %2687 = vst [vmem:[%s4640_s10 + $0xa0] sm:$0xff] %v2359_v62  ;;  %v2363_v47 = vadd.f32 %v2362_v63, %v4633_v22  ;;  %v2364_v11 = vpop.f32.mrb[23].mxu0 }
 0x1a8   : > { %2688 = vst [vmem:[%s4640_s10 + $0xa8] sm:$0xff] %v2361_v52  ;;  %v2538_v53 = vpop.f32.mrb[20].mxu1  ;;  %v2365_v50 = vadd.f32 %v2364_v11, %v4635_v44 }
 0x1a9   : > { %v2539_v31 = vadd.f32 %v2538_v53, %v4633_v22  ;;  %2689 = vst [vmem:[%s4640_s10 + $0xb0] sm:$0xff] %v2363_v47  ;;  %v2540_v55 = vpop.f32.mrb[21].mxu1 }
 0x1aa   : > { %v2541_v2 = vadd.f32 %v2540_v55, %v4635_v44  ;;  %2690 = vst [vmem:[%s4640_s10 + $0xb8] sm:$0xff] %v2365_v50  ;;  %v2542_v18 = vpop.f32.mrb[22].mxu1 }
 0x1ab   : > { %2759 = vst [vmem:[%s4640_s10 + $0x2e0] sm:$0xff] %v2539_v31  ;;  %v2543_v21 = vadd.f32 %v2542_v18, %v4633_v22  ;;  %v2544_v33 = vpop.f32.mrb[23].mxu1 }
 0x1ac   : > { %2760 = vst [vmem:[%s4640_s10 + $0x2e8] sm:$0xff] %v2541_v2  ;;  %v2545_v27 = vadd.f32 %v2544_v33, %v4635_v44  ;;  %v2368_v7 = vpop.f32.mrb[24].mxu0 }
 0x1ad   : > { %2761 = vst [vmem:[%s4640_s10 + $0x2f0] sm:$0xff] %v2543_v21  ;;  %v2369_v36 = vadd.f32 %v2368_v7, %v4633_v22  ;;  %v2370_v38 = vpop.f32.mrb[25].mxu0 }
 0x1ae   : > { %2762 = vst [vmem:[%s4640_s10 + $0x2f8] sm:$0xff] %v2545_v27  ;;  %v2371_v17 = vadd.f32 %v2370_v38, %v4635_v44  ;;  %v2372_v60 = vpop.f32.mrb[26].mxu0 }
 0x1af   : > { %2691 = vst [vmem:[%s4640_s10 + $0xc0] sm:$0xff] %v2369_v36  ;;  %v2373_v32 = vadd.f32 %v2372_v60, %v4633_v22  ;;  %v2374_v13 = vpop.f32.mrb[27].mxu0 }
 0x1b0   : > { %2692 = vst [vmem:[%s4640_s10 + $0xc8] sm:$0xff] %v2371_v17  ;;  %v2548_v14 = vpop.f32.mrb[24].mxu1  ;;  %v2375_v26 = vadd.f32 %v2374_v13, %v4635_v44 }
 0x1b1   : > { %v2549_v9 = vadd.f32 %v2548_v14, %v4633_v22  ;;  %2693 = vst [vmem:[%s4640_s10 + $0xd0] sm:$0xff] %v2373_v32  ;;  %v2550_v6 = vpop.f32.mrb[25].mxu1 }
 0x1b2   : > { %v2551_v24 = vadd.f32 %v2550_v6, %v4635_v44  ;;  %2694 = vst [vmem:[%s4640_s10 + $0xd8] sm:$0xff] %v2375_v26  ;;  %v2552_v4 = vpop.f32.mrb[26].mxu1 }
 0x1b3   : > { %2763 = vst [vmem:[%s4640_s10 + $0x300] sm:$0xff] %v2549_v9  ;;  %v2553_v12 = vadd.f32 %v2552_v4, %v4633_v22  ;;  %v2554_v34 = vpop.f32.mrb[27].mxu1 }
 0x1b4   : > { %2764 = vst [vmem:[%s4640_s10 + $0x308] sm:$0xff] %v2551_v24  ;;  %v2555_v45 = vadd.f32 %v2554_v34, %v4635_v44  ;;  %v2378_v37 = vpop.f32.mrb[28].mxu0 }
 0x1b5   : > { %2765 = vst [vmem:[%s4640_s10 + $0x310] sm:$0xff] %v2553_v12  ;;  %v2379_v19 = vadd.f32 %v2378_v37, %v4633_v22  ;;  %v2380_v51 = vpop.f32.mrb[29].mxu0 }
 0x1b6   : > { %2766 = vst [vmem:[%s4640_s10 + $0x318] sm:$0xff] %v2555_v45  ;;  %v2381_v28 = vadd.f32 %v2380_v51, %v4635_v44  ;;  %v2382_v20 = vpop.f32.mrb[30].mxu0 }
 0x1b7   : > { %2695 = vst [vmem:[%s4640_s10 + $0xe0] sm:$0xff] %v2379_v19  ;;  %v2383_v59 = vadd.f32 %v2382_v20, %v4633_v22  ;;  %v2384_v46 = vpop.f32.mrb[31].mxu0 }
 0x1b8   : > { %2696 = vst [vmem:[%s4640_s10 + $0xe8] sm:$0xff] %v2381_v28  ;;  %v2558_v35 = vpop.f32.mrb[28].mxu1  ;;  %v2385_v0 = vadd.f32 %v2384_v46, %v4635_v44 }
 0x1b9   : > { %v2559_v61 = vadd.f32 %v2558_v35, %v4633_v22  ;;  %2697 = vst [vmem:[%s4640_s10 + $0xf0] sm:$0xff] %v2383_v59  ;;  %v2560_v43 = vpop.f32.mrb[29].mxu1 }
 0x1ba   : > { %v2561_v40 = vadd.f32 %v2560_v43, %v4635_v44  ;;  %2698 = vst [vmem:[%s4640_s10 + $0xf8] sm:$0xff] %v2385_v0  ;;  %v2562_v3 = vpop.f32.mrb[30].mxu1 }
 0x1bb   : > { %2767 = vst [vmem:[%s4640_s10 + $0x320] sm:$0xff] %v2559_v61  ;;  %v2563_v30 = vadd.f32 %v2562_v3, %v4633_v22  ;;  %v2564_v58 = vpop.f32.mrb[31].mxu1 }
 0x1bc   : > { %2768 = vst [vmem:[%s4640_s10 + $0x328] sm:$0xff] %v2561_v40  ;;  %v2565_v57 = vadd.f32 %v2564_v58, %v4635_v44  ;;  %v2388_v25 = vpop.f32.mrb[32].mxu0 }
 0x1bd   : > { %2769 = vst [vmem:[%s4640_s10 + $0x330] sm:$0xff] %v2563_v30  ;;  %v2389_v29 = vadd.f32 %v2388_v25, %v4633_v22  ;;  %v2390_v42 = vpop.f32.mrb[33].mxu0 }
 0x1be   : > { %2770 = vst [vmem:[%s4640_s10 + $0x338] sm:$0xff] %v2565_v57  ;;  %v2391_v39 = vadd.f32 %v2390_v42, %v4635_v44  ;;  %v2392_v16 = vpop.f32.mrb[34].mxu0 }
 0x1bf   : > { %2699 = vst [vmem:[%s4640_s10 + $0x100] sm:$0xff] %v2389_v29  ;;  %v2393_v48 = vadd.f32 %v2392_v16, %v4633_v22  ;;  %v2394_v56 = vpop.f32.mrb[35].mxu0 }
 0x1c0   : > { %2700 = vst [vmem:[%s4640_s10 + $0x108] sm:$0xff] %v2391_v39  ;;  %v2568_v8 = vpop.f32.mrb[32].mxu1  ;;  %v2395_v1 = vadd.f32 %v2394_v56, %v4635_v44 }
 0x1c1   : > { %v2569_v41 = vadd.f32 %v2568_v8, %v4633_v22  ;;  %2701 = vst [vmem:[%s4640_s10 + $0x110] sm:$0xff] %v2393_v48  ;;  %v2570_v49 = vpop.f32.mrb[33].mxu1 }
 0x1c2   : > { %v2571_v5 = vadd.f32 %v2570_v49, %v4635_v44  ;;  %2702 = vst [vmem:[%s4640_s10 + $0x118] sm:$0xff] %v2395_v1  ;;  %v2572_v23 = vpop.f32.mrb[34].mxu1 }
 0x1c3   : > { %2771 = vst [vmem:[%s4640_s10 + $0x340] sm:$0xff] %v2569_v41  ;;  %v2573_v54 = vadd.f32 %v2572_v23, %v4633_v22  ;;  %v2574_v10 = vpop.f32.mrb[35].mxu1 }
 0x1c4   : > { %2772 = vst [vmem:[%s4640_s10 + $0x348] sm:$0xff] %v2571_v5  ;;  %v2575_v62 = vadd.f32 %v2574_v10, %v4635_v44  ;;  %v2398_v15 = vpop.f32.mrb[36].mxu0 }
 0x1c5   : > { %2773 = vst [vmem:[%s4640_s10 + $0x350] sm:$0xff] %v2573_v54  ;;  %v2399_v52 = vadd.f32 %v2398_v15, %v4633_v22  ;;  %v2400_v63 = vpop.f32.mrb[37].mxu0 }
 0x1c6   : > { %2774 = vst [vmem:[%s4640_s10 + $0x358] sm:$0xff] %v2575_v62  ;;  %v2401_v47 = vadd.f32 %v2400_v63, %v4635_v44  ;;  %v2402_v11 = vpop.f32.mrb[38].mxu0 }
 0x1c7   : > { %2703 = vst [vmem:[%s4640_s10 + $0x120] sm:$0xff] %v2399_v52  ;;  %v2403_v53 = vadd.f32 %v2402_v11, %v4633_v22  ;;  %v2404_v50 = vpop.f32.mrb[39].mxu0 }
 0x1c8   : > { %2704 = vst [vmem:[%s4640_s10 + $0x128] sm:$0xff] %v2401_v47  ;;  %v2405_v31 = vadd.f32 %v2404_v50, %v4635_v44 }
 0x1c9   : > { %v2578_v55 = vpop.f32.mrb[36].mxu1  ;;  %2705 = vst [vmem:[%s4640_s10 + $0x130] sm:$0xff] %v2403_v53 }
 0x1ca   : > { %v2579_v2 = vadd.f32 %v2578_v55, %v4633_v22  ;;  %v2580_v18 = vpop.f32.mrb[37].mxu1  ;;  %2706 = vst [vmem:[%s4640_s10 + $0x138] sm:$0xff] %v2405_v31 }
 0x1cb   : > { %v2581_v21 = vadd.f32 %v2580_v18, %v4635_v44  ;;  %v2582_v33 = vpop.f32.mrb[38].mxu1 }
 0x1cc   : > { %2775 = vst [vmem:[%s4640_s10 + $0x360] sm:$0xff] %v2579_v2  ;;  %v2583_v27 = vadd.f32 %v2582_v33, %v4633_v22  ;;  %v2584_v7 = vpop.f32.mrb[39].mxu1 }
 0x1cd   : > { %2776 = vst [vmem:[%s4640_s10 + $0x368] sm:$0xff] %v2581_v21  ;;  %v2585_v36 = vadd.f32 %v2584_v7, %v4635_v44  ;;  %v2408_v38 = vpop.f32.mrb[40].mxu0 }
 0x1ce   : > { %2777 = vst [vmem:[%s4640_s10 + $0x370] sm:$0xff] %v2583_v27  ;;  %v2409_v17 = vadd.f32 %v2408_v38, %v4633_v22  ;;  %v2410_v60 = vpop.f32.mrb[41].mxu0 }
 0x1cf   : > { %2778 = vst [vmem:[%s4640_s10 + $0x378] sm:$0xff] %v2585_v36  ;;  %v2411_v32 = vadd.f32 %v2410_v60, %v4635_v44  ;;  %v2412_v13 = vpop.f32.mrb[42].mxu0 }
 0x1d0   : > { %2707 = vst [vmem:[%s4640_s10 + $0x140] sm:$0xff] %v2409_v17  ;;  %v2413_v14 = vadd.f32 %v2412_v13, %v4633_v22  ;;  %v2414_v26 = vpop.f32.mrb[43].mxu0 }
 0x1d1   : > { %2708 = vst [vmem:[%s4640_s10 + $0x148] sm:$0xff] %v2411_v32  ;;  %v2588_v9 = vpop.f32.mrb[40].mxu1  ;;  %v2415_v6 = vadd.f32 %v2414_v26, %v4635_v44 }
 0x1d2   : > { %v2589_v24 = vadd.f32 %v2588_v9, %v4633_v22  ;;  %2709 = vst [vmem:[%s4640_s10 + $0x150] sm:$0xff] %v2413_v14  ;;  %v2590_v4 = vpop.f32.mrb[41].mxu1 }
 0x1d3   : > { %v2591_v12 = vadd.f32 %v2590_v4, %v4635_v44  ;;  %2710 = vst [vmem:[%s4640_s10 + $0x158] sm:$0xff] %v2415_v6  ;;  %v2592_v34 = vpop.f32.mrb[42].mxu1 }
 0x1d4   : > { %2779 = vst [vmem:[%s4640_s10 + $0x380] sm:$0xff] %v2589_v24  ;;  %v2593_v45 = vadd.f32 %v2592_v34, %v4633_v22  ;;  %v2594_v37 = vpop.f32.mrb[43].mxu1 }
 0x1d5   : > { %2780 = vst [vmem:[%s4640_s10 + $0x388] sm:$0xff] %v2591_v12  ;;  %v2595_v19 = vadd.f32 %v2594_v37, %v4635_v44 }
 0x1d6   : > { %2781 = vst [vmem:[%s4640_s10 + $0x390] sm:$0xff] %v2593_v45  ;;  %v2418_v51 = vpop.f32.mrb[44].mxu0 }
 0x1d7   : > { %2782 = vst [vmem:[%s4640_s10 + $0x398] sm:$0xff] %v2595_v19  ;;  %v2419_v28 = vadd.f32 %v2418_v51, %v4633_v22  ;;  %v2420_v20 = vpop.f32.mrb[45].mxu0 }
 0x1d8   : > { %v2421_v59 = vadd.f32 %v2420_v20, %v4635_v44  ;;  %v2422_v46 = vpop.f32.mrb[46].mxu0 }
 0x1d9   : > { %2711 = vst [vmem:[%s4640_s10 + $0x160] sm:$0xff] %v2419_v28  ;;  %v2598_v35 = vpop.f32.mrb[44].mxu1  ;;  %v2423_v0 = vadd.f32 %v2422_v46, %v4633_v22  ;;  %v2424_v61 = vpop.f32.mrb[47].mxu0 }
 0x1da   : > { %2712 = vst [vmem:[%s4640_s10 + $0x168] sm:$0xff] %v2421_v59  ;;  %v2599_v43 = vadd.f32 %v2598_v35, %v4633_v22  ;;  %v2600_v40 = vpop.f32.mrb[45].mxu1  ;;  %v2425_v3 = vadd.f32 %v2424_v61, %v4635_v44 }
 0x1db   : > { %2713 = vst [vmem:[%s4640_s10 + $0x170] sm:$0xff] %v2423_v0  ;;  %v2601_v30 = vadd.f32 %v2600_v40, %v4635_v44  ;;  %v2602_v58 = vpop.f32.mrb[46].mxu1 }
 0x1dc   : > { %2783 = vst [vmem:[%s4640_s10 + $0x3a0] sm:$0xff] %v2599_v43  ;;  %2714 = vst [vmem:[%s4640_s10 + $0x178] sm:$0xff] %v2425_v3  ;;  %v2603_v57 = vadd.f32 %v2602_v58, %v4633_v22  ;;  %v2604_v25 = vpop.f32.mrb[47].mxu1 }
 0x1dd   : > { %2784 = vst [vmem:[%s4640_s10 + $0x3a8] sm:$0xff] %v2601_v30  ;;  %v2605_v29 = vadd.f32 %v2604_v25, %v4635_v44 }
 0x1de   : > { %2785 = vst [vmem:[%s4640_s10 + $0x3b0] sm:$0xff] %v2603_v57  ;;  %v2428_v42 = vpop.f32.mrb[48].mxu0 }
 0x1df   : > { %2786 = vst [vmem:[%s4640_s10 + $0x3b8] sm:$0xff] %v2605_v29  ;;  %v2429_v39 = vadd.f32 %v2428_v42, %v4633_v22  ;;  %v2430_v16 = vpop.f32.mrb[49].mxu0 }
 0x1e0   : > { %v2431_v48 = vadd.f32 %v2430_v16, %v4635_v44  ;;  %v2432_v56 = vpop.f32.mrb[50].mxu0 }
 0x1e1   : > { %2715 = vst [vmem:[%s4640_s10 + $0x180] sm:$0xff] %v2429_v39  ;;  %v2433_v8 = vadd.f32 %v2432_v56, %v4633_v22  ;;  %v2434_v1 = vpop.f32.mrb[51].mxu0 }
 0x1e2   : > { %2716 = vst [vmem:[%s4640_s10 + $0x188] sm:$0xff] %v2431_v48  ;;  %v2608_v41 = vpop.f32.mrb[48].mxu1  ;;  %v2435_v49 = vadd.f32 %v2434_v1, %v4635_v44 }
 0x1e3   : > { %v2609_v5 = vadd.f32 %v2608_v41, %v4633_v22  ;;  %2717 = vst [vmem:[%s4640_s10 + $0x190] sm:$0xff] %v2433_v8  ;;  %v2610_v23 = vpop.f32.mrb[49].mxu1 }
 0x1e4   : > { %v2611_v54 = vadd.f32 %v2610_v23, %v4635_v44  ;;  %2718 = vst [vmem:[%s4640_s10 + $0x198] sm:$0xff] %v2435_v49  ;;  %v2612_v10 = vpop.f32.mrb[50].mxu1 }
 0x1e5   : > { %2787 = vst [vmem:[%s4640_s10 + $0x3c0] sm:$0xff] %v2609_v5  ;;  %v2613_v62 = vadd.f32 %v2612_v10, %v4633_v22  ;;  %v2614_v15 = vpop.f32.mrb[51].mxu1 }
 0x1e6   : > { %2788 = vst [vmem:[%s4640_s10 + $0x3c8] sm:$0xff] %v2611_v54  ;;  %v2615_v52 = vadd.f32 %v2614_v15, %v4635_v44 }
 0x1e7   : > { %2789 = vst [vmem:[%s4640_s10 + $0x3d0] sm:$0xff] %v2613_v62  ;;  %v2438_v63 = vpop.f32.mrb[52].mxu0 }
 0x1e8   : > { %2790 = vst [vmem:[%s4640_s10 + $0x3d8] sm:$0xff] %v2615_v52  ;;  %v2439_v47 = vadd.f32 %v2438_v63, %v4633_v22  ;;  %v2440_v11 = vpop.f32.mrb[53].mxu0 }
 0x1e9   : > { %v2441_v53 = vadd.f32 %v2440_v11, %v4635_v44  ;;  %v2442_v50 = vpop.f32.mrb[54].mxu0 }
 0x1ea   : > { %2719 = vst [vmem:[%s4640_s10 + $0x1a0] sm:$0xff] %v2439_v47  ;;  %v2443_v31 = vadd.f32 %v2442_v50, %v4633_v22  ;;  %v2444_v55 = vpop.f32.mrb[55].mxu0 }
 0x1eb   : > { %2720 = vst [vmem:[%s4640_s10 + $0x1a8] sm:$0xff] %v2441_v53  ;;  %v2445_v2 = vadd.f32 %v2444_v55, %v4635_v44 }
 0x1ec   : > { %v2618_v18 = vpop.f32.mrb[52].mxu1  ;;  %2721 = vst [vmem:[%s4640_s10 + $0x1b0] sm:$0xff] %v2443_v31 }
 0x1ed   : > { %v2619_v21 = vadd.f32 %v2618_v18, %v4633_v22  ;;  %v2620_v33 = vpop.f32.mrb[53].mxu1  ;;  %2722 = vst [vmem:[%s4640_s10 + $0x1b8] sm:$0xff] %v2445_v2 }
 0x1ee   : > { %v2621_v27 = vadd.f32 %v2620_v33, %v4635_v44  ;;  %v2622_v7 = vpop.f32.mrb[54].mxu1 }
 0x1ef   : > { %2791 = vst [vmem:[%s4640_s10 + $0x3e0] sm:$0xff] %v2619_v21  ;;  %v2623_v36 = vadd.f32 %v2622_v7, %v4633_v22  ;;  %v2624_v38 = vpop.f32.mrb[55].mxu1  ;;  %v2448_v17 = vpop.f32.mrb[56].mxu0 }
 0x1f0   : > { %2792 = vst [vmem:[%s4640_s10 + $0x3e8] sm:$0xff] %v2621_v27  ;;  %v2625_v60 = vadd.f32 %v2624_v38, %v4635_v44  ;;  %v2449_v32 = vadd.f32 %v2448_v17, %v4633_v22  ;;  %v2450_v13 = vpop.f32.mrb[57].mxu0 }
 0x1f1   : > { %2793 = vst [vmem:[%s4640_s10 + $0x3f0] sm:$0xff] %v2623_v36  ;;  %v2451_v14 = vadd.f32 %v2450_v13, %v4635_v44  ;;  %v2452_v26 = vpop.f32.mrb[58].mxu0 }
 0x1f2   : > { %2794 = vst [vmem:[%s4640_s10 + $0x3f8] sm:$0xff] %v2625_v60  ;;  %2723 = vst [vmem:[%s4640_s10 + $0x1c0] sm:$0xff] %v2449_v32  ;;  %v2453_v9 = vadd.f32 %v2452_v26, %v4633_v22  ;;  %v2454_v6 = vpop.f32.mrb[59].mxu0 }
 0x1f3   : > { %2724 = vst [vmem:[%s4640_s10 + $0x1c8] sm:$0xff] %v2451_v14  ;;  %v2455_v24 = vadd.f32 %v2454_v6, %v4635_v44 }
 0x1f4   : > { %v2628_v4 = vpop.f32.mrb[56].mxu1  ;;  %2725 = vst [vmem:[%s4640_s10 + $0x1d0] sm:$0xff] %v2453_v9 }
 0x1f5   : > { %v2629_v12 = vadd.f32 %v2628_v4, %v4633_v22  ;;  %v2630_v34 = vpop.f32.mrb[57].mxu1  ;;  %2726 = vst [vmem:[%s4640_s10 + $0x1d8] sm:$0xff] %v2455_v24 }
 0x1f6   : > { %v2631_v45 = vadd.f32 %v2630_v34, %v4635_v44  ;;  %v2632_v37 = vpop.f32.mrb[58].mxu1 }
 0x1f7   : > { %2795 = vst [vmem:[%s4640_s10 + $0x400] sm:$0xff] %v2629_v12  ;;  %v2633_v19 = vadd.f32 %v2632_v37, %v4633_v22  ;;  %v2634_v51 = vpop.f32.mrb[59].mxu1 }
 0x1f8   : > { %2796 = vst [vmem:[%s4640_s10 + $0x408] sm:$0xff] %v2631_v45  ;;  %v2635_v28 = vadd.f32 %v2634_v51, %v4635_v44 }
 0x1f9   : > { %2797 = vst [vmem:[%s4640_s10 + $0x410] sm:$0xff] %v2633_v19 }
 0x1fa   : > { %2798 = vst [vmem:[%s4640_s10 + $0x418] sm:$0xff] %v2635_v28  ;;  %v2458_v20 = vpop.f32.mrb[60].mxu0 }
 0x1fb   : > { %v2459_v59 = vadd.f32 %v2458_v20, %v4633_v22  ;;  %v2460_v46 = vpop.f32.mrb[61].mxu0 }
 0x1fc   : > { %v2461_v35 = vadd.f32 %v2460_v46, %v4635_v44  ;;  %v2462_v0 = vpop.f32.mrb[62].mxu0 }
 0x1fd   : > { %2727 = vst [vmem:[%s4640_s10 + $0x1e0] sm:$0xff] %v2459_v59  ;;  %v2463_v61 = vadd.f32 %v2462_v0, %v4633_v22  ;;  %v2464_v43 = vpop.f32.mrb[63].mxu0  ;;  %v2638_v40 = vpop.f32.mrb[60].mxu1 }
 0x1fe   : > { %2728 = vst [vmem:[%s4640_s10 + $0x1e8] sm:$0xff] %v2461_v35  ;;  %v2465_v3 = vadd.f32 %v2464_v43, %v4635_v44  ;;  %v2639_v30 = vadd.f32 %v2638_v40, %v4633_v22  ;;  %v2640_v58 = vpop.f32.mrb[61].mxu1 }
 0x1ff   : > { %2729 = vst [vmem:[%s4640_s10 + $0x1f0] sm:$0xff] %v2463_v61  ;;  %v2641_v57 = vadd.f32 %v2640_v58, %v4635_v44  ;;  %v2642_v25 = vpop.f32.mrb[62].mxu1 }
 0x200   : > { %2730 = vst [vmem:[%s4640_s10 + $0x1f8] sm:$0xff] %v2465_v3  ;;  %2799 = vst [vmem:[%s4640_s10 + $0x420] sm:$0xff] %v2639_v30  ;;  %v2643_v29 = vadd.f32 %v2642_v25, %v4633_v22  ;;  %v2644_v42 = vpop.f32.mrb[63].mxu1 }
 0x201   : > { %2800 = vst [vmem:[%s4640_s10 + $0x428] sm:$0xff] %v2641_v57  ;;  %v2645_v39 = vadd.f32 %v2644_v42, %v4635_v44 }
 0x202   : > { %2801 = vst [vmem:[%s4640_s10 + $0x430] sm:$0xff] %v2643_v29  ;;  %v2468_v16 = vpop.f32.mrb[64].mxu0 }
 0x203   : > { %2802 = vst [vmem:[%s4640_s10 + $0x438] sm:$0xff] %v2645_v39  ;;  %v2469_v48 = vadd.f32 %v2468_v16, %v4633_v22  ;;  %v2470_v56 = vpop.f32.mrb[65].mxu0 }
 0x204   : > { %v2471_v8 = vadd.f32 %v2470_v56, %v4635_v44  ;;  %v2472_v1 = vpop.f32.mrb[66].mxu0 }
 0x205   : > { %2731 = vst [vmem:[%s4640_s10 + $0x200] sm:$0xff] %v2469_v48  ;;  %v2473_v41 = vadd.f32 %v2472_v1, %v4633_v22  ;;  %v2474_v49 = vpop.f32.mrb[67].mxu0 }
 0x206   : > { %2732 = vst [vmem:[%s4640_s10 + $0x208] sm:$0xff] %v2471_v8  ;;  %v2475_v23 = vadd.f32 %v2474_v49, %v4635_v44 }
 0x207   : > { %v2648_v5 = vpop.f32.mrb[64].mxu1  ;;  %2733 = vst [vmem:[%s4640_s10 + $0x210] sm:$0xff] %v2473_v41 }
 0x208   : > { %v2649_v54 = vadd.f32 %v2648_v5, %v4633_v22  ;;  %v2650_v10 = vpop.f32.mrb[65].mxu1  ;;  %2734 = vst [vmem:[%s4640_s10 + $0x218] sm:$0xff] %v2475_v23 }
 0x209   : > { %v2651_v62 = vadd.f32 %v2650_v10, %v4635_v44  ;;  %v2652_v15 = vpop.f32.mrb[66].mxu1 }
 0x20a   : > { %2803 = vst [vmem:[%s4640_s10 + $0x440] sm:$0xff] %v2649_v54  ;;  %v2653_v52 = vadd.f32 %v2652_v15, %v4633_v22  ;;  %v2654_v63 = vpop.f32.mrb[67].mxu1  ;;  %v2478_v11 = vpop.f32.mrb[68].mxu0 }
 0x20b   : > { %2804 = vst [vmem:[%s4640_s10 + $0x448] sm:$0xff] %v2651_v62  ;;  %v2655_v47 = vadd.f32 %v2654_v63, %v4635_v44  ;;  %v2479_v53 = vadd.f32 %v2478_v11, %v4633_v22  ;;  %v2480_v50 = vpop.f32.mrb[69].mxu0 }
 0x20c   : > { %2805 = vst [vmem:[%s4640_s10 + $0x450] sm:$0xff] %v2653_v52  ;;  %v2481_v31 = vadd.f32 %v2480_v50, %v4635_v44  ;;  %v2482_v55 = vpop.f32.mrb[70].mxu0 }
 0x20d   : > { %2806 = vst [vmem:[%s4640_s10 + $0x458] sm:$0xff] %v2655_v47  ;;  %2735 = vst [vmem:[%s4640_s10 + $0x220] sm:$0xff] %v2479_v53  ;;  %v2483_v2 = vadd.f32 %v2482_v55, %v4633_v22  ;;  %v2484_v18 = vpop.f32.mrb[71].mxu0 }
 0x20e   : > { %2736 = vst [vmem:[%s4640_s10 + $0x228] sm:$0xff] %v2481_v31  ;;  %v2485_v33 = vadd.f32 %v2484_v18, %v4635_v44 }
 0x20f   : > { %v2658_v21 = vpop.f32.mrb[68].mxu1  ;;  %2737 = vst [vmem:[%s4640_s10 + $0x230] sm:$0xff] %v2483_v2 }
 0x210   : > { %v2659_v27 = vadd.f32 %v2658_v21, %v4633_v22  ;;  %v2660_v7 = vpop.f32.mrb[69].mxu1  ;;  %2738 = vst [vmem:[%s4640_s10 + $0x238] sm:$0xff] %v2485_v33 }
 0x211   : > { %v2661_v36 = vadd.f32 %v2660_v7, %v4635_v44  ;;  %v2662_v38 = vpop.f32.mrb[70].mxu1 }
 0x212   : > { %2807 = vst [vmem:[%s4640_s10 + $0x460] sm:$0xff] %v2659_v27  ;;  %v2663_v17 = vadd.f32 %v2662_v38, %v4633_v22  ;;  %v2664_v60 = vpop.f32.mrb[71].mxu1 }
 0x213   : > { %2808 = vst [vmem:[%s4640_s10 + $0x468] sm:$0xff] %v2661_v36  ;;  %v2665_v32 = vadd.f32 %v2664_v60, %v4635_v44 }
 0x214   : > { %2809 = vst [vmem:[%s4640_s10 + $0x470] sm:$0xff] %v2663_v17 }
 0x215   : > { %2810 = vst [vmem:[%s4640_s10 + $0x478] sm:$0xff] %v2665_v32 }
 0x216 PF: > { %s14_s17 = sadd.s32 1, %s3372_s17   ;;  %s4964_s15 = smov %s3368_s16 }
 0x217   : > { %p11_p5 = scmp.ge.s32.totalorder %s14_s17, 4   ;;  %s4965_s16 = smov %s4967_s18 }
 0x219   :  { %13 = sbr.rel (!%p11_p5) target bundleno = 2 (0x2), region = 69 }

</bundles_post_ra>
